<compile_context>
chip_gen: v7x
topology: tpu7x:2x2x1
jax: 0.10.0
libtpu: 0.0.40
codegen_flags: <defaults>
</compile_context>

<pallas_src>
import jax
import jax.numpy as jnp
from jax.experimental import pallas as pl
from jax.experimental.pallas import tpu as pltpu


def _round_up(n, m):
    return ((n + m - 1) // m) * m


# ---------------------------------------------------------------------------
# Kernel: full VAE forward hot path (6 matmuls + activations + sampling)
# ---------------------------------------------------------------------------
def vae_fwd_kernel(
    x_ref, eps_ref,
    w1_ref, b1_ref,      # fc1 : x_pad  -> h_dim1
    w2_ref, b2_ref,      # fc2 : h_dim1 -> h_dim2
    w3_ref, b3_ref,      # fc31|fc32 fused : h_dim2 -> 2*z_dim  (mu | log_var)
    w4_ref, b4_ref,      # fc4 : z_dim  -> h_dim2
    w5_ref, b5_ref,      # fc5 : h_dim2 -> h_dim1
    w6_ref, b6_ref,      # fc6 : h_dim1 -> x_pad
    recon_ref, muvar_ref,
):
    mx = jnp.bfloat16  # MXU input dtype; accumulation stays f32
    z_dim = eps_ref.shape[1]

    x = x_ref[...]

    # ---- encoder ----
    h = jnp.dot(x.astype(mx), w1_ref[...],
                preferred_element_type=jnp.float32) + b1_ref[...]
    h = jnp.maximum(h, 0.0)
    h = jnp.dot(h.astype(mx), w2_ref[...],
                preferred_element_type=jnp.float32) + b2_ref[...]
    h = jnp.maximum(h, 0.0)

    # fused latent projection: [mu | log_var] in one lane-dense matmul
    mv = jnp.dot(h.astype(mx), w3_ref[...],
                 preferred_element_type=jnp.float32) + b3_ref[...]
    mu = mv[:, :z_dim]
    log_var = mv[:, z_dim:]

    # ---- sampling (reparameterization): z = eps * exp(0.5*log_var) + mu ----
    std = jnp.exp(0.5 * log_var)
    z = eps_ref[...] * std + mu

    # ---- decoder ----
    d = jnp.dot(z.astype(mx), w4_ref[...],
                preferred_element_type=jnp.float32) + b4_ref[...]
    d = jnp.maximum(d, 0.0)
    d = jnp.dot(d.astype(mx), w5_ref[...],
                preferred_element_type=jnp.float32) + b5_ref[...]
    d = jnp.maximum(d, 0.0)
    logits = jnp.dot(d.astype(mx), w6_ref[...],
                     preferred_element_type=jnp.float32) + b6_ref[...]

    # sigmoid = 1 / (1 + exp(-x)); exp + approx reciprocal both run on the EUP
    recon = pl.reciprocal(1.0 + jnp.exp(-logits), approx=True)

    recon_ref[...] = recon.astype(recon_ref.dtype)
    muvar_ref[...] = mv.astype(muvar_ref.dtype)


# ---------------------------------------------------------------------------
# Wrapper: parameter packing, padding, pallas_call
# ---------------------------------------------------------------------------
def vae_forward(x, eps, params, *, batch_tile=None):
    """x: (B, x_dim) float32, eps: (B, z_dim) float32.

    Returns (recon (B, x_dim), mu (B, z_dim), log_var (B, z_dim)), all f32.
    """
    B, x_dim = x.shape
    z_dim = eps.shape[1]
    h_dim1 = params["w1"].shape[1]
    h_dim2 = params["w2"].shape[1]

    # ---- batch tiling: whole batch for small inputs, up to 512 rows else ----
    if batch_tile is None:
        batch_tile = min(512, _round_up(B, 8))
    batch_tile = _round_up(batch_tile, 8)
    B_pad = _round_up(B, batch_tile)

    # ---- pad x_dim to a multiple of 128 (784 -> 896) for lane-dense I/O ----
    x_pad = _round_up(x_dim, 128)
    mx = jnp.bfloat16  # MXU weight dtype

    w1 = params["w1"]
    w6 = params["w6"]
    b6 = params["b6"]
    if x_pad != x_dim:
        x = jnp.pad(x, ((0, 0), (0, x_pad - x_dim)))
        w1 = jnp.pad(w1, ((0, x_pad - x_dim), (0, 0)))
        w6 = jnp.pad(w6, ((0, 0), (0, x_pad - x_dim)))
        b6 = jnp.pad(b6, ((0, 0), (0, x_pad - x_dim)))
    if B_pad != B:
        x = jnp.pad(x, ((0, B_pad - B), (0, 0)))
        eps = jnp.pad(eps, ((0, B_pad - B), (0, 0)))

    # ---- fuse fc31 | fc32 into one (h_dim2, 2*z_dim) projection ----
    w3 = jnp.concatenate([params["w31"], params["w32"]], axis=1)
    b3 = jnp.concatenate([params["b31"], params["b32"]], axis=1)

    # weights -> bf16 (MXU inputs), biases stay f32
    w1 = w1.astype(mx)
    w2 = params["w2"].astype(mx)
    w3 = w3.astype(mx)
    w4 = params["w4"].astype(mx)
    w5 = params["w5"].astype(mx)
    w6 = w6.astype(mx)

    def act_spec(feat):
        # tile over batch only; feature dim carried whole (lane-dense)
        return pl.BlockSpec((batch_tile, feat), lambda i: (i, 0))

    def weight_spec(shape):
        # whole weight / bias, constant index_map => resident across all tiles
        # (could additionally be single-buffered via pipeline_mode=pl.Buffered(1)
        #  to save VMEM at very large batch tiles)
        return pl.BlockSpec(shape, lambda i: (0, 0))

    in_specs = [
        act_spec(x_pad),               # x
        act_spec(z_dim),               # eps
        weight_spec((x_pad, h_dim1)),  weight_spec((1, h_dim1)),    # fc1
        weight_spec((h_dim1, h_dim2)), weight_spec((1, h_dim2)),    # fc2
        weight_spec((h_dim2, 2 * z_dim)), weight_spec((1, 2 * z_dim)),  # fc31|32
        weight_spec((z_dim, h_dim2)),  weight_spec((1, h_dim2)),    # fc4
        weight_spec((h_dim2, h_dim1)), weight_spec((1, h_dim1)),    # fc5
        weight_spec((h_dim1, x_pad)),  weight_spec((1, x_pad)),     # fc6
    ]
    out_specs = (act_spec(x_pad), act_spec(2 * z_dim))
    out_shape = (
        jax.ShapeDtypeStruct((B_pad, x_pad), jnp.float32),
        jax.ShapeDtypeStruct((B_pad, 2 * z_dim), jnp.float32),
    )

    grid_spec = pltpu.PrefetchScalarGridSpec(
        num_scalar_prefetch=0,
        grid=(B_pad // batch_tile,),
        in_specs=in_specs,
        out_specs=out_specs,
    )

    fn = pl.pallas_call(
        vae_fwd_kernel,
        out_shape=out_shape,
        grid_spec=grid_spec,
        compiler_params=pltpu.CompilerParams(
            dimension_semantics=("parallel",),
            vmem_limit_bytes=48 * 1024 * 1024,
        ),
    )
    recon_p, muvar = fn(
        x, eps,
        w1, params["b1"],
        w2, params["b2"],
        w3, b3,
        w4, params["b4"],
        w5, params["b5"],
        w6, b6,
    )

    recon = recon_p[:B, :x_dim]
    mu = muvar[:B, :z_dim]
    log_var = muvar[:B, z_dim:]
    return recon, mu, log_var


def init_params(key, x_dim, h_dim1, h_dim2, z_dim):
    """Deterministic init; weights stored as (in, out) — already transposed
    relative to PyTorch's nn.Linear (out, in).  All f32; the wrapper handles
    bf16 casting / fusion / padding."""
    def linear(k, fan_in, fan_out):
        kw, kb = jax.random.split(k)
        bound = 1.0 / jnp.sqrt(fan_in)
        w = jax.random.uniform(kw, (fan_in, fan_out), jnp.float32, -bound, bound)
        b = jax.random.uniform(kb, (1, fan_out), jnp.float32, -bound, bound)
        return w, b

    keys = jax.random.split(key, 7)
    p = {}
    p["w1"], p["b1"] = linear(keys[0], x_dim, h_dim1)
    p["w2"], p["b2"] = linear(keys[1], h_dim1, h_dim2)
    p["w31"], p["b31"] = linear(keys[2], h_dim2, z_dim)
    p["w32"], p["b32"] = linear(keys[3], h_dim2, z_dim)
    p["w4"], p["b4"] = linear(keys[4], z_dim, h_dim2)
    p["w5"], p["b5"] = linear(keys[5], h_dim2, h_dim1)
    p["w6"], p["b6"] = linear(keys[6], h_dim1, x_dim)
    return p


def vae_reference(x, eps, params):
    """Pure-JAX f32 reference of the same forward pass (for verification)."""
    h = jax.nn.relu(x @ params["w1"] + params["b1"])
    h = jax.nn.relu(h @ params["w2"] + params["b2"])
    mu = h @ params["w31"] + params["b31"]
    log_var = h @ params["w32"] + params["b32"]
    z = eps * jnp.exp(0.5 * log_var) + mu
    d = jax.nn.relu(z @ params["w4"] + params["b4"])
    d = jax.nn.relu(d @ params["w5"] + params["b5"])
    recon = jax.nn.sigmoid(d @ params["w6"] + params["b6"])
    return recon, mu, log_var


def _check(recon, mu, log_var, x, eps, params, x_dim, z_dim, B, tag):
    r_ref, mu_ref, lv_ref = vae_reference(x, eps, params)
    # bf16 matmul inputs + approx-reciprocal sigmoid => loosened tolerance
    assert recon.shape == (B, x_dim) and mu.shape == (B, z_dim) \
        and log_var.shape == (B, z_dim), f"{tag}: bad shapes"
    assert jnp.allclose(recon, r_ref, atol=1e-2), f"{tag}: recon mismatch"
    assert jnp.allclose(mu, mu_ref, atol=1e-2), f"{tag}: mu mismatch"
    assert jnp.allclose(log_var, lv_ref, atol=1e-2), f"{tag}: log_var mismatch"


if __name__ == "__main__":
    # forward() does x.view(-1, 784), so x_dim is fixed at 784 (MNIST 28x28).
    x_dim, h_dim1, h_dim2, z_dim = 784, 256, 128, 32

    key = jax.random.PRNGKey(0)
    k_params, k_x1, k_e1, k_x2, k_e2 = jax.random.split(key, 5)
    params = init_params(k_params, x_dim, h_dim1, h_dim2, z_dim)

    # --- case 1: non-multiple-of-8 batch, whole batch in one grid step -----
    B1 = 20
    x1 = jax.random.uniform(k_x1, (B1, 1, 28, 28), jnp.float32).reshape(-1, x_dim)
    eps1 = jax.random.normal(k_e1, (B1, z_dim), jnp.float32)
    r1, mu1, lv1 = vae_forward(x1, eps1, params)           # auto batch_tile
    jax.block_until_ready((r1, mu1, lv1))
    _check(r1, mu1, lv1, x1, eps1, params, x_dim, z_dim, B1, "case1")

    # --- case 2: multi-step parallel grid (exercises batch tiling path) ----
    B2, tile2 = 32, 8
    x2 = jax.random.uniform(k_x2, (B2, 1, 28, 28), jnp.float32).reshape(-1, x_dim)
    eps2 = jax.random.normal(k_e2, (B2, z_dim), jnp.float32)
    r2, mu2, lv2 = vae_forward(x2, eps2, params, batch_tile=tile2)
    jax.block_until_ready((r2, mu2, lv2))
    _check(r2, mu2, lv2, x2, eps2, params, x_dim, z_dim, B2, "case2")

    print("KERNEL_OK")
</pallas_src>

<mosaic_0001>
module attributes {stable_mosaic.version = 11 : i64} {
  func.func @vae_fwd_kernel(%arg0: i32, %arg1: memref<24x896xf32, #tpu.memory_space<vmem>>, %arg2: memref<24x32xf32, #tpu.memory_space<vmem>>, %arg3: memref<896x256xbf16, #tpu.memory_space<vmem>>, %arg4: memref<1x256xf32, #tpu.memory_space<vmem>>, %arg5: memref<256x128xbf16, #tpu.memory_space<vmem>>, %arg6: memref<1x128xf32, #tpu.memory_space<vmem>>, %arg7: memref<128x64xbf16, #tpu.memory_space<vmem>>, %arg8: memref<1x64xf32, #tpu.memory_space<vmem>>, %arg9: memref<32x128xbf16, #tpu.memory_space<vmem>>, %arg10: memref<1x128xf32, #tpu.memory_space<vmem>>, %arg11: memref<128x256xbf16, #tpu.memory_space<vmem>>, %arg12: memref<1x256xf32, #tpu.memory_space<vmem>>, %arg13: memref<256x896xbf16, #tpu.memory_space<vmem>>, %arg14: memref<1x896xf32, #tpu.memory_space<vmem>>, %arg15: memref<24x896xf32, #tpu.memory_space<vmem>>, %arg16: memref<24x64xf32, #tpu.memory_space<vmem>>) attributes {dimension_semantics = [#tpu.dimension_semantics<parallel>], iteration_bounds = array<i64: 1>, scalar_prefetch = 0 : i64, scratch_operands = 0 : i64, tpu.core_type = #tpu.core_type<tc>, window_params = [{transform_indices = @transform_0, window_bounds = array<i64: 24, 896>}, {transform_indices = @transform_1, window_bounds = array<i64: 24, 32>}, {pipeline_mode = #tpu.pipeline_mode<synchronous>, transform_indices = @transform_2, window_bounds = array<i64: 896, 256>}, {pipeline_mode = #tpu.pipeline_mode<synchronous>, transform_indices = @transform_3, window_bounds = array<i64: 1, 256>}, {pipeline_mode = #tpu.pipeline_mode<synchronous>, transform_indices = @transform_4, window_bounds = array<i64: 256, 128>}, {pipeline_mode = #tpu.pipeline_mode<synchronous>, transform_indices = @transform_5, window_bounds = array<i64: 1, 128>}, {pipeline_mode = #tpu.pipeline_mode<synchronous>, transform_indices = @transform_6, window_bounds = array<i64: 128, 64>}, {pipeline_mode = #tpu.pipeline_mode<synchronous>, transform_indices = @transform_7, window_bounds = array<i64: 1, 64>}, {pipeline_mode = #tpu.pipeline_mode<synchronous>, transform_indices = @transform_8, window_bounds = array<i64: 32, 128>}, {pipeline_mode = #tpu.pipeline_mode<synchronous>, transform_indices = @transform_9, window_bounds = array<i64: 1, 128>}, {pipeline_mode = #tpu.pipeline_mode<synchronous>, transform_indices = @transform_10, window_bounds = array<i64: 128, 256>}, {pipeline_mode = #tpu.pipeline_mode<synchronous>, transform_indices = @transform_11, window_bounds = array<i64: 1, 256>}, {pipeline_mode = #tpu.pipeline_mode<synchronous>, transform_indices = @transform_12, window_bounds = array<i64: 256, 896>}, {pipeline_mode = #tpu.pipeline_mode<synchronous>, transform_indices = @transform_13, window_bounds = array<i64: 1, 896>}, {transform_indices = @transform_14, window_bounds = array<i64: 24, 896>}, {transform_indices = @transform_15, window_bounds = array<i64: 24, 64>}]} {
    %c0 = arith.constant 0 : index
    %c0_0 = arith.constant 0 : index
    %0 = vector.load %arg1[%c0, %c0_0] : memref<24x896xf32, #tpu.memory_space<vmem>>, vector<24x896xf32>
    %1 = arith.truncf %0 : vector<24x896xf32> to vector<24x896xbf16>
    %c0_1 = arith.constant 0 : index
    %c0_2 = arith.constant 0 : index
    %2 = vector.load %arg3[%c0_1, %c0_2] : memref<896x256xbf16, #tpu.memory_space<vmem>>, vector<896x256xbf16>
    %cst = arith.constant dense<0.000000e+00> : vector<24x256xf32>
    %3 = tpu.matmul %1, %2, %cst {dimension_numbers = #tpu.dot_dimension_numbers<[1], [0], [0], [1], [0, 0, 1, 1], [], []>} : vector<24x896xbf16>, vector<896x256xbf16>, vector<24x256xf32> -> vector<24x256xf32>
    %c0_3 = arith.constant 0 : index
    %c0_4 = arith.constant 0 : index
    %4 = vector.load %arg4[%c0_3, %c0_4] : memref<1x256xf32, #tpu.memory_space<vmem>>, vector<1x256xf32>
    %5 = vector.broadcast %4 : vector<1x256xf32> to vector<24x256xf32>
    %6 = arith.addf %3, %5 : vector<24x256xf32>
    %cst_5 = arith.constant 0.000000e+00 : f32
    %7 = vector.broadcast %cst_5 : f32 to vector<24x256xf32>
    %8 = arith.maximumf %6, %7 : vector<24x256xf32>
    %9 = arith.truncf %8 : vector<24x256xf32> to vector<24x256xbf16>
    %c0_6 = arith.constant 0 : index
    %c0_7 = arith.constant 0 : index
    %10 = vector.load %arg5[%c0_6, %c0_7] : memref<256x128xbf16, #tpu.memory_space<vmem>>, vector<256x128xbf16>
    %cst_8 = arith.constant dense<0.000000e+00> : vector<24x128xf32>
    %11 = tpu.matmul %9, %10, %cst_8 {dimension_numbers = #tpu.dot_dimension_numbers<[1], [0], [0], [1], [0, 0, 1, 1], [], []>} : vector<24x256xbf16>, vector<256x128xbf16>, vector<24x128xf32> -> vector<24x128xf32>
    %c0_9 = arith.constant 0 : index
    %c0_10 = arith.constant 0 : index
    %12 = vector.load %arg6[%c0_9, %c0_10] : memref<1x128xf32, #tpu.memory_space<vmem>>, vector<1x128xf32>
    %13 = vector.broadcast %12 : vector<1x128xf32> to vector<24x128xf32>
    %14 = arith.addf %11, %13 : vector<24x128xf32>
    %cst_11 = arith.constant 0.000000e+00 : f32
    %15 = vector.broadcast %cst_11 : f32 to vector<24x128xf32>
    %16 = arith.maximumf %14, %15 : vector<24x128xf32>
    %17 = arith.truncf %16 : vector<24x128xf32> to vector<24x128xbf16>
    %c0_12 = arith.constant 0 : index
    %c0_13 = arith.constant 0 : index
    %18 = vector.load %arg7[%c0_12, %c0_13] : memref<128x64xbf16, #tpu.memory_space<vmem>>, vector<128x64xbf16>
    %cst_14 = arith.constant dense<0.000000e+00> : vector<24x64xf32>
    %19 = tpu.matmul %17, %18, %cst_14 {dimension_numbers = #tpu.dot_dimension_numbers<[1], [0], [0], [1], [0, 0, 1, 1], [], []>} : vector<24x128xbf16>, vector<128x64xbf16>, vector<24x64xf32> -> vector<24x64xf32>
    %c0_15 = arith.constant 0 : index
    %c0_16 = arith.constant 0 : index
    %20 = vector.load %arg8[%c0_15, %c0_16] : memref<1x64xf32, #tpu.memory_space<vmem>>, vector<1x64xf32>
    %21 = vector.broadcast %20 : vector<1x64xf32> to vector<24x64xf32>
    %22 = arith.addf %19, %21 : vector<24x64xf32>
    %23 = vector.extract_strided_slice %22 {offsets = [0, 0], sizes = [24, 32], strides = [1, 1]} : vector<24x64xf32> to vector<24x32xf32>
    %24 = vector.extract_strided_slice %22 {offsets = [0, 32], sizes = [24, 32], strides = [1, 1]} : vector<24x64xf32> to vector<24x32xf32>
    %cst_17 = arith.constant 5.000000e-01 : f32
    %25 = vector.broadcast %cst_17 : f32 to vector<24x32xf32>
    %26 = arith.mulf %25, %24 : vector<24x32xf32>
    %27 = math.exp %26 : vector<24x32xf32>
    %c0_18 = arith.constant 0 : index
    %c0_19 = arith.constant 0 : index
    %28 = vector.load %arg2[%c0_18, %c0_19] : memref<24x32xf32, #tpu.memory_space<vmem>>, vector<24x32xf32>
    %29 = arith.mulf %28, %27 : vector<24x32xf32>
    %30 = arith.addf %29, %23 : vector<24x32xf32>
    %31 = arith.truncf %30 : vector<24x32xf32> to vector<24x32xbf16>
    %c0_20 = arith.constant 0 : index
    %c0_21 = arith.constant 0 : index
    %32 = vector.load %arg9[%c0_20, %c0_21] : memref<32x128xbf16, #tpu.memory_space<vmem>>, vector<32x128xbf16>
    %cst_22 = arith.constant dense<0.000000e+00> : vector<24x128xf32>
    %33 = tpu.matmul %31, %32, %cst_22 {dimension_numbers = #tpu.dot_dimension_numbers<[1], [0], [0], [1], [0, 0, 1, 1], [], []>} : vector<24x32xbf16>, vector<32x128xbf16>, vector<24x128xf32> -> vector<24x128xf32>
    %c0_23 = arith.constant 0 : index
    %c0_24 = arith.constant 0 : index
    %34 = vector.load %arg10[%c0_23, %c0_24] : memref<1x128xf32, #tpu.memory_space<vmem>>, vector<1x128xf32>
    %35 = vector.broadcast %34 : vector<1x128xf32> to vector<24x128xf32>
    %36 = arith.addf %33, %35 : vector<24x128xf32>
    %cst_25 = arith.constant 0.000000e+00 : f32
    %37 = vector.broadcast %cst_25 : f32 to vector<24x128xf32>
    %38 = arith.maximumf %36, %37 : vector<24x128xf32>
    %39 = arith.truncf %38 : vector<24x128xf32> to vector<24x128xbf16>
    %c0_26 = arith.constant 0 : index
    %c0_27 = arith.constant 0 : index
    %40 = vector.load %arg11[%c0_26, %c0_27] : memref<128x256xbf16, #tpu.memory_space<vmem>>, vector<128x256xbf16>
    %cst_28 = arith.constant dense<0.000000e+00> : vector<24x256xf32>
    %41 = tpu.matmul %39, %40, %cst_28 {dimension_numbers = #tpu.dot_dimension_numbers<[1], [0], [0], [1], [0, 0, 1, 1], [], []>} : vector<24x128xbf16>, vector<128x256xbf16>, vector<24x256xf32> -> vector<24x256xf32>
    %c0_29 = arith.constant 0 : index
    %c0_30 = arith.constant 0 : index
    %42 = vector.load %arg12[%c0_29, %c0_30] : memref<1x256xf32, #tpu.memory_space<vmem>>, vector<1x256xf32>
    %43 = vector.broadcast %42 : vector<1x256xf32> to vector<24x256xf32>
    %44 = arith.addf %41, %43 : vector<24x256xf32>
    %cst_31 = arith.constant 0.000000e+00 : f32
    %45 = vector.broadcast %cst_31 : f32 to vector<24x256xf32>
    %46 = arith.maximumf %44, %45 : vector<24x256xf32>
    %47 = arith.truncf %46 : vector<24x256xf32> to vector<24x256xbf16>
    %c0_32 = arith.constant 0 : index
    %c0_33 = arith.constant 0 : index
    %48 = vector.load %arg13[%c0_32, %c0_33] : memref<256x896xbf16, #tpu.memory_space<vmem>>, vector<256x896xbf16>
    %cst_34 = arith.constant dense<0.000000e+00> : vector<24x896xf32>
    %49 = tpu.matmul %47, %48, %cst_34 {dimension_numbers = #tpu.dot_dimension_numbers<[1], [0], [0], [1], [0, 0, 1, 1], [], []>} : vector<24x256xbf16>, vector<256x896xbf16>, vector<24x896xf32> -> vector<24x896xf32>
    %c0_35 = arith.constant 0 : index
    %c0_36 = arith.constant 0 : index
    %50 = vector.load %arg14[%c0_35, %c0_36] : memref<1x896xf32, #tpu.memory_space<vmem>>, vector<1x896xf32>
    %51 = vector.broadcast %50 : vector<1x896xf32> to vector<24x896xf32>
    %52 = arith.addf %49, %51 : vector<24x896xf32>
    %cst_37 = arith.constant 0.000000e+00 : f32
    %53 = vector.broadcast %cst_37 : f32 to vector<24x896xf32>
    %54 = arith.subf %53, %52 : vector<24x896xf32>
    %55 = math.exp %54 : vector<24x896xf32>
    %cst_38 = arith.constant 1.000000e+00 : f32
    %56 = vector.broadcast %cst_38 : f32 to vector<24x896xf32>
    %57 = arith.addf %56, %55 : vector<24x896xf32>
    %58 = tpu.reciprocal %57 {approx = true} : vector<24x896xf32> -> vector<24x896xf32>
    %c0_39 = arith.constant 0 : index
    %c0_40 = arith.constant 0 : index
    %59 = vector.load %arg15[%c0_39, %c0_40] : memref<24x896xf32, #tpu.memory_space<vmem>>, vector<24x896xf32>
    tpu.vector_store %arg15[%c0_39, %c0_40], %58 {strides = array<i32>} : memref<24x896xf32, #tpu.memory_space<vmem>>, vector<24x896xf32>,
    %c0_41 = arith.constant 0 : index
    %c0_42 = arith.constant 0 : index
    %60 = vector.load %arg16[%c0_41, %c0_42] : memref<24x64xf32, #tpu.memory_space<vmem>>, vector<24x64xf32>
    tpu.vector_store %arg16[%c0_41, %c0_42], %22 {strides = array<i32>} : memref<24x64xf32, #tpu.memory_space<vmem>>, vector<24x64xf32>,
    return
  }
  func.func @transform_0(%arg0: i32) -> (i32, i32) {
    %c0_i32 = arith.constant 0 : i32
    %c0_i32_0 = arith.constant 0 : i32
    return %arg0, %c0_i32 : i32, i32
  }
  func.func @transform_1(%arg0: i32) -> (i32, i32) {
    %c0_i32 = arith.constant 0 : i32
    %c0_i32_0 = arith.constant 0 : i32
    return %arg0, %c0_i32 : i32, i32
  }
  func.func @transform_2(%arg0: i32) -> (i32, i32) {
    %c0_i32 = arith.constant 0 : i32
    %c0_i32_0 = arith.constant 0 : i32
    %c0_i32_1 = arith.constant 0 : i32
    return %c0_i32, %c0_i32_0 : i32, i32
  }
  func.func @transform_3(%arg0: i32) -> (i32, i32) {
    %c0_i32 = arith.constant 0 : i32
    %c0_i32_0 = arith.constant 0 : i32
    %c0_i32_1 = arith.constant 0 : i32
    return %c0_i32, %c0_i32_0 : i32, i32
  }
  func.func @transform_4(%arg0: i32) -> (i32, i32) {
    %c0_i32 = arith.constant 0 : i32
    %c0_i32_0 = arith.constant 0 : i32
    %c0_i32_1 = arith.constant 0 : i32
    return %c0_i32, %c0_i32_0 : i32, i32
  }
  func.func @transform_5(%arg0: i32) -> (i32, i32) {
    %c0_i32 = arith.constant 0 : i32
    %c0_i32_0 = arith.constant 0 : i32
    %c0_i32_1 = arith.constant 0 : i32
    return %c0_i32, %c0_i32_0 : i32, i32
  }
  func.func @transform_6(%arg0: i32) -> (i32, i32) {
    %c0_i32 = arith.constant 0 : i32
    %c0_i32_0 = arith.constant 0 : i32
    %c0_i32_1 = arith.constant 0 : i32
    return %c0_i32, %c0_i32_0 : i32, i32
  }
  func.func @transform_7(%arg0: i32) -> (i32, i32) {
    %c0_i32 = arith.constant 0 : i32
    %c0_i32_0 = arith.constant 0 : i32
    %c0_i32_1 = arith.constant 0 : i32
    return %c0_i32, %c0_i32_0 : i32, i32
  }
  func.func @transform_8(%arg0: i32) -> (i32, i32) {
    %c0_i32 = arith.constant 0 : i32
    %c0_i32_0 = arith.constant 0 : i32
    %c0_i32_1 = arith.constant 0 : i32
    return %c0_i32, %c0_i32_0 : i32, i32
  }
  func.func @transform_9(%arg0: i32) -> (i32, i32) {
    %c0_i32 = arith.constant 0 : i32
    %c0_i32_0 = arith.constant 0 : i32
    %c0_i32_1 = arith.constant 0 : i32
    return %c0_i32, %c0_i32_0 : i32, i32
  }
  func.func @transform_10(%arg0: i32) -> (i32, i32) {
    %c0_i32 = arith.constant 0 : i32
    %c0_i32_0 = arith.constant 0 : i32
    %c0_i32_1 = arith.constant 0 : i32
    return %c0_i32, %c0_i32_0 : i32, i32
  }
  func.func @transform_11(%arg0: i32) -> (i32, i32) {
    %c0_i32 = arith.constant 0 : i32
    %c0_i32_0 = arith.constant 0 : i32
    %c0_i32_1 = arith.constant 0 : i32
    return %c0_i32, %c0_i32_0 : i32, i32
  }
  func.func @transform_12(%arg0: i32) -> (i32, i32) {
    %c0_i32 = arith.constant 0 : i32
    %c0_i32_0 = arith.constant 0 : i32
    %c0_i32_1 = arith.constant 0 : i32
    return %c0_i32, %c0_i32_0 : i32, i32
  }
  func.func @transform_13(%arg0: i32) -> (i32, i32) {
    %c0_i32 = arith.constant 0 : i32
    %c0_i32_0 = arith.constant 0 : i32
    %c0_i32_1 = arith.constant 0 : i32
    return %c0_i32, %c0_i32_0 : i32, i32
  }
  func.func @transform_14(%arg0: i32) -> (i32, i32) {
    %c0_i32 = arith.constant 0 : i32
    %c0_i32_0 = arith.constant 0 : i32
    return %arg0, %c0_i32 : i32, i32
  }
  func.func @transform_15(%arg0: i32) -> (i32, i32) {
    %c0_i32 = arith.constant 0 : i32
    %c0_i32_0 = arith.constant 0 : i32
    return %arg0, %c0_i32 : i32, i32
  }
}

</mosaic_0001>

<bundles_post_ra>
// kernel: tpu_custom_call.1
= control target key start
LH: loop header
LB: loop body
LE: loop exit
PB: predicated region body
PF: predicated region fallthrough
CT: control target
= control target key end

     0   :  { %21 = vsyncpa [#allocation3], 0  ;;  %s4384_s0 = inlined_call_operand.hbm [shape: f32[24,896], index: 0, kind: input, shape index: {}]   ;;  %s4385_s1 = inlined_call_operand.hbm [shape: f32[24,32], index: 1, kind: input, shape index: {}]   ;;  %s4386_s2 = inlined_call_operand.hbm [shape: bf16[896,256], index: 2, kind: input, shape index: {}]   ;;  %s4387_s3 = inlined_call_operand.vmem [shape: f32[1,256], index: 3, kind: input, shape index: {}]   ;;  %s4388_s4 = inlined_call_operand.hbm [shape: bf16[256,128], index: 4, kind: input, shape index: {}]   ;;  %s4389_s5 = inlined_call_operand.hbm [shape: f32[1,128], index: 5, kind: input, shape index: {}]   ;;  %s4390_s6 = inlined_call_operand.vmem [shape: bf16[128,64], index: 6, kind: input, shape index: {}]   ;;  %s4391_s7 = inlined_call_operand.hbm [shape: f32[1,64], index: 7, kind: input, shape index: {}]   ;;  %s4392_s8 = inlined_call_operand.hbm [shape: bf16[32,128], index: 8, kind: input, shape index: {}]   ;;  %s4393_s9 = inlined_call_operand.hbm [shape: f32[1,128], index: 9, kind: input, shape index: {}]   ;;  %s4394_s10 = inlined_call_operand.vmem [shape: bf16[128,256], index: 10, kind: input, shape index: {}]   ;;  %s4395_s11 = inlined_call_operand.hbm [shape: f32[1,256], index: 11, kind: input, shape index: {}]   ;;  %s4396_s12 = inlined_call_operand.hbm [shape: bf16[256,896], index: 12, kind: input, shape index: {}]   ;;  %s4397_s13 = inlined_call_operand.vmem [shape: f32[1,896], index: 13, kind: input, shape index: {}]   ;;  %s4398_s14 = inlined_call_operand.hbm [shape: f32[24,896], index: 14, kind: output, shape index: {0}]   ;;  %s4399_s15 = inlined_call_operand.hbm [shape: f32[24,64], index: 15, kind: output, shape index: {1}]  }
   0x1   :  { %22 = vsyncpa [#allocation6], 0 }
   0x2   :  { %23 = vsyncpa [#allocation9], 0 }
   0x3   :  { %24 = vsyncpa [#allocation12], 0 }
   0x4   :  { %25 = vsyncpa [#allocation15], 0 }
   0x5   :  { %26 = vsyncpa [#allocation18], 0 }
   0x6   :  { %27 = vsyncpa [#allocation4], 0 }
   0x7   :  { %28 = vsyncpa [#allocation21], 0  ;;  %s3983_s18 = smov [#allocation5]   ;;  %s3703_s22 = scalar_lea.hbm %s4385_s1, 384 }
   0x8   :  { %s46_s19 = sshll.u32 %s3983_s18, 4  ;;  %p3704_p0 = scmp.ne.s32.totalorder %s4385_s1, %s3703_s22  ;;  %s47_s19 = int_to_ptr.vmem [resolvable:$true] %s46_s19 }
   0x9   :  { %p3707_p1 = scmp.lt.u32.totalorder %s3703_s22, %s4385_s1 }
   0xb   :  { %p3709_p2 = pnand %p3707_p1, %p3704_p0 }
   0xd   :  { %3712 = shalt.err (!%p3709_p2)
}
   0xe   :  { %s3713_s27 = scalar_lea.vmem %s47_s19, 384  ;;  %p3718_p4 = scmp.lt.s32.totalorder %s47_s19, %s47_s19 }
   0xf   :  { %p3714_p3 = scmp.ne.s32.totalorder %s47_s19, %s3713_s27  ;;  %p3719_p5 = scmp.lt.s32.totalorder %s3713_s27, %s3713_s27 }
  0x11   :  { %p3720_p6 = por %p3719_p5, %p3718_p4 }
  0x13   :  { %p3721_p7 = pnand %p3720_p6, %p3714_p3 }
  0x15   :  { %3724 = shalt.err (!%p3721_p7)
}
  0x16   :  { %s4400_s28 = smov 128   ;;  %s4402_s29 = smov 8  }
  0x17   :  { %52 = dma.hbm_to_vmem [thread:$0]  %s4385_s1, 384, %s47_s19, [#allocation6], %s4400_s28, %s4400_s28, %s4402_s29  }
  0x18   :  { %s3986_s17 = smov [#allocation8]   ;;  %s3725_s22 = scalar_lea.hbm %s4388_s4, 2048 }
  0x19   :  { %s72_s18 = sshll.u32 %s3986_s17, 4  ;;  %p3726_p8 = scmp.ne.s32.totalorder %s4388_s4, %s3725_s22  ;;  %s73_s18 = int_to_ptr.vmem [resolvable:$true] %s72_s18 }
  0x1a   :  { %p3729_p9 = scmp.lt.u32.totalorder %s3725_s22, %s4388_s4 }
  0x1c   :  { %p3731_p10 = pnand %p3729_p9, %p3726_p8 }
  0x1e   :  { %3734 = shalt.err (!%p3731_p10)
}
  0x1f   :  { %s3735_s27 = scalar_lea.vmem %s73_s18, 2048  ;;  %p3740_p12 = scmp.lt.s32.totalorder %s73_s18, %s73_s18 }
  0x20   :  { %p3736_p11 = scmp.ne.s32.totalorder %s73_s18, %s3735_s27  ;;  %p3741_p13 = scmp.lt.s32.totalorder %s3735_s27, %s3735_s27 }
  0x22   :  { %p3742_p0 = por %p3741_p13, %p3740_p12 }
  0x24   :  { %p3743_p1 = pnand %p3742_p0, %p3736_p11 }
  0x26   :  { %3746 = shalt.err (!%p3743_p1)
}
  0x27   :  { %s3987_s1 = smov 64   ;;  %s3988_s19 = smov 4  }
  0x28   :  { %78 = dma.hbm_to_vmem [thread:$0]  %s4388_s4, 2048, %s73_s18, [#allocation9], %s3987_s1, %s3987_s1, %s3988_s19  }
  0x29   :  { %s3989_s17 = smov [#allocation11]   ;;  %s3990_s21 = smov [#allocation14]  }
  0x2a   :  { %s97_s20 = sshll.u32 %s3989_s17, 4  ;;  %s119_s22 = sshll.u32 %s3990_s21, 4  ;;  %s98_s20 = int_to_ptr.vmem [resolvable:$true] %s97_s20  ;;  %s120_s22 = int_to_ptr.vmem [resolvable:$true] %s119_s22 }
  0x2b   :  { %s3747_s25 = scalar_lea.hbm %s4391_s7, 16 }
  0x2c   :  { %p3748_p2 = scmp.ne.s32.totalorder %s4391_s7, %s3747_s25  ;;  %p3751_p3 = scmp.lt.u32.totalorder %s3747_s25, %s4391_s7 }
  0x2e   :  { %p3753_p4 = pnand %p3751_p3, %p3748_p2 }
  0x30   :  { %3756 = shalt.err (!%p3753_p4)
}
  0x31   :  { %s3757_s4 = scalar_lea.vmem %s98_s20, 16  ;;  %s3761_s18 = scalar_lea.vmem %s98_s20, 32 }
  0x32   :  { %p3758_p5 = scmp.ne.s32.totalorder %s98_s20, %s3757_s4  ;;  %p3762_p6 = scmp.lt.s32.totalorder %s98_s20, %s98_s20 }
  0x33   :  { %p3763_p7 = scmp.lt.s32.totalorder %s3761_s18, %s3757_s4 }
  0x35   :  { %p3764_p8 = por %p3763_p7, %p3762_p6 }
  0x37   :  { %p3765_p9 = pnand %p3764_p8, %p3758_p5 }
  0x39   :  { %3768 = shalt.err (!%p3765_p9)
}
  0x3a   :  { %100 = dma.hbm_to_vmem [thread:$0]  %s4391_s7, 16, %s98_s20, [#allocation12]  }
  0x3b   :  { %s3769_s23 = scalar_lea.hbm %s4393_s9, 16 }
  0x3c   :  { %p3770_p10 = scmp.ne.s32.totalorder %s4393_s9, %s3769_s23  ;;  %p3773_p11 = scmp.lt.u32.totalorder %s3769_s23, %s4393_s9 }
  0x3e   :  { %p3775_p12 = pnand %p3773_p11, %p3770_p10 }
  0x40   :  { %3778 = shalt.err (!%p3775_p12)
}
  0x41   :  { %s3779_s26 = scalar_lea.vmem %s120_s22, 16  ;;  %s3783_s27 = scalar_lea.vmem %s120_s22, 32 }
  0x42   :  { %p3780_p13 = scmp.ne.s32.totalorder %s120_s22, %s3779_s26  ;;  %p3784_p0 = scmp.lt.s32.totalorder %s120_s22, %s120_s22 }
  0x43   :  { %p3785_p1 = scmp.lt.s32.totalorder %s3783_s27, %s3779_s26 }
  0x45   :  { %p3786_p2 = por %p3785_p1, %p3784_p0 }
  0x47   :  { %p3787_p3 = pnand %p3786_p2, %p3780_p13 }
  0x49   :  { %3790 = shalt.err (!%p3787_p3)
}
  0x4a   :  { %122 = dma.hbm_to_vmem [thread:$0]  %s4393_s9, 16, %s120_s22, [#allocation15]  }
  0x4b   :  { %s3991_s4 = smov [#allocation2]   ;;  %s3791_s17 = scalar_lea.hbm %s4384_s0, 2688 }
  0x4c   :  { %s34_s18 = sshll.u32 %s3991_s4, 4  ;;  %p3792_p4 = scmp.ne.s32.totalorder %s4384_s0, %s3791_s17  ;;  %s35_s18 = int_to_ptr.vmem [resolvable:$true] %s34_s18 }
  0x4d   :  { %p3795_p5 = scmp.lt.u32.totalorder %s3791_s17, %s4384_s0 }
  0x4f   :  { %p3797_p6 = pnand %p3795_p5, %p3792_p4 }
  0x51   :  { %3800 = shalt.err (!%p3797_p6)
}
  0x52   :  { %s3801_s24 = scalar_lea.vmem %s35_s18, 2688  ;;  %p3806_p8 = scmp.lt.s32.totalorder %s35_s18, %s35_s18 }
  0x53   :  { %p3802_p7 = scmp.ne.s32.totalorder %s35_s18, %s3801_s24  ;;  %p3807_p9 = scmp.lt.s32.totalorder %s3801_s24, %s3801_s24 }
  0x55   :  { %p3808_p10 = por %p3807_p9, %p3806_p8 }
  0x57   :  { %p3809_p11 = pnand %p3808_p10, %p3802_p7 }
  0x59   :  { %3812 = shalt.err (!%p3809_p11)
}
  0x5a   :  { %s3992_s9 = smov 896   ;;  %s3993_s22 = smov 56  }
  0x5b   :  { %40 = dma.hbm_to_vmem [thread:$0]  %s4384_s0, 2688, %s35_s18, [#allocation3], %s3992_s9, %s3992_s9, %s3993_s22  }
  0x5c   :  { %s3994_s27 = smov [#allocation7]   ;;  %s3995_s20 = smov [#allocation10]  }
  0x5d   :  { %s58_s7 = sshll.u32 %s3994_s27, 4  ;;  %s85_s4 = sshll.u32 %s3995_s20, 4  ;;  %s59_s7 = int_to_ptr.vmem [resolvable:$true] %s58_s7  ;;  %s86_s4 = int_to_ptr.vmem [resolvable:$true] %s85_s4 }
  0x5e   :  { %s3813_s17 = scalar_lea.hbm %s4386_s2, 14336 }
  0x5f   :  { %p3814_p12 = scmp.ne.s32.totalorder %s4386_s2, %s3813_s17  ;;  %p3817_p13 = scmp.lt.u32.totalorder %s3813_s17, %s4386_s2 }
  0x61   :  { %p3819_p0 = pnand %p3817_p13, %p3814_p12 }
  0x63   :  { %3822 = shalt.err (!%p3819_p0)
}
  0x64   :  { %s3823_s0 = scalar_lea.vmem %s59_s7, 14336  ;;  %p3828_p2 = scmp.lt.s32.totalorder %s59_s7, %s59_s7 }
  0x65   :  { %p3824_p1 = scmp.ne.s32.totalorder %s59_s7, %s3823_s0  ;;  %p3829_p3 = scmp.lt.s32.totalorder %s3823_s0, %s3823_s0 }
  0x67   :  { %p3830_p4 = por %p3829_p3, %p3828_p2 }
  0x69   :  { %p3831_p5 = pnand %p3830_p4, %p3824_p1 }
  0x6b   :  { %3834 = shalt.err (!%p3831_p5)
}
  0x6c   :  { %s4404_s18 = smov 8   ;;  %s4405_s24 = smov 128  }
  0x6d   :  { %64 = dma.hbm_to_vmem [thread:$0]  %s4386_s2, 14336, %s59_s7, [#allocation6], %s4405_s24, %s4405_s24, %s4404_s18  }
  0x6e   :  { %s3835_s30 = scalar_lea.hbm %s4389_s5, 16 }
  0x6f   :  { %p3836_p6 = scmp.ne.s32.totalorder %s4389_s5, %s3835_s30  ;;  %p3839_p7 = scmp.lt.u32.totalorder %s3835_s30, %s4389_s5 }
  0x71   :  { %p3841_p8 = pnand %p3839_p7, %p3836_p6 }
  0x73   :  { %3844 = shalt.err (!%p3841_p8)
}
  0x74   :  { %s3845_s28 = scalar_lea.vmem %s86_s4, 16  ;;  %s3849_s29 = scalar_lea.vmem %s86_s4, 32 }
  0x75   :  { %p3846_p9 = scmp.ne.s32.totalorder %s86_s4, %s3845_s28  ;;  %p3850_p10 = scmp.lt.s32.totalorder %s86_s4, %s86_s4 }
  0x76   :  { %p3851_p11 = scmp.lt.s32.totalorder %s3849_s29, %s3845_s28 }
  0x78   :  { %p3852_p12 = por %p3851_p11, %p3850_p10 }
  0x7a   :  { %p3853_p13 = pnand %p3852_p12, %p3846_p9 }
  0x7c   :  { %3856 = shalt.err (!%p3853_p13)
}
  0x7d   :  { %88 = dma.hbm_to_vmem [thread:$0]  %s4389_s5, 16, %s86_s4, [#allocation9]  }
  0x7e   :  { %s3996_s0 = smov [#allocation13]   ;;  %s3997_s26 = smov [#allocation16]  }
  0x7f   :  { %s106_s25 = sshll.u32 %s3996_s0, 4  ;;  %s131_s27 = sshll.u32 %s3997_s26, 4  ;;  %s107_s25 = int_to_ptr.vmem [resolvable:$true] %s106_s25  ;;  %s132_s27 = int_to_ptr.vmem [resolvable:$true] %s131_s27 }
  0x80   :  { %s3857_s16 = scalar_lea.hbm %s4392_s8, 256 }
  0x81   :  { %p3858_p0 = scmp.ne.s32.totalorder %s4392_s8, %s3857_s16  ;;  %p3861_p1 = scmp.lt.u32.totalorder %s3857_s16, %s4392_s8 }
  0x83   :  { %p3863_p2 = pnand %p3861_p1, %p3858_p0 }
  0x85   :  { %3866 = shalt.err (!%p3863_p2)
}
  0x86   :  { %s3867_s5 = scalar_lea.vmem %s107_s25, 256  ;;  %p3872_p4 = scmp.lt.s32.totalorder %s107_s25, %s107_s25 }
  0x87   :  { %p3868_p3 = scmp.ne.s32.totalorder %s107_s25, %s3867_s5  ;;  %p3873_p5 = scmp.lt.s32.totalorder %s3867_s5, %s3867_s5 }
  0x89   :  { %p3874_p6 = por %p3873_p5, %p3872_p4 }
  0x8b   :  { %p3875_p7 = pnand %p3874_p6, %p3868_p3 }
  0x8d   :  { %3878 = shalt.err (!%p3875_p7)
}
  0x8e   :  { %112 = dma.hbm_to_vmem [thread:$0]  %s4392_s8, 256, %s107_s25, [#allocation12], %s3987_s1, %s3987_s1, %s3988_s19  }
  0x8f   :  { %s3879_s0 = scalar_lea.hbm %s4395_s11, 32 }
  0x90   :  { %p3880_p8 = scmp.ne.s32.totalorder %s4395_s11, %s3879_s0  ;;  %p3883_p9 = scmp.lt.u32.totalorder %s3879_s0, %s4395_s11 }
  0x92   :  { %p3885_p10 = pnand %p3883_p9, %p3880_p8 }
  0x94   :  { %3888 = shalt.err (!%p3885_p10)
}
  0x95   :  { %s3889_s17 = scalar_lea.vmem %s132_s27, 32  ;;  %p3894_p12 = scmp.lt.s32.totalorder %s132_s27, %s132_s27 }
  0x96   :  { %p3890_p11 = scmp.ne.s32.totalorder %s132_s27, %s3889_s17  ;;  %p3895_p13 = scmp.lt.s32.totalorder %s3889_s17, %s3889_s17 }
  0x98   :  { %p3896_p0 = por %p3895_p13, %p3894_p12 }
  0x9a   :  { %p3897_p1 = pnand %p3896_p0, %p3890_p11 }
  0x9c   :  { %3900 = shalt.err (!%p3897_p1)
}
  0x9d   :  { %134 = dma.hbm_to_vmem [thread:$0]  %s4395_s11, 32, %s132_s27, [#allocation15]  }
  0x9e   :  { %s3998_s19 = smov [#allocation17]   ;;  %s3901_s28 = scalar_lea.hbm %s4396_s12, 14336 }
  0x9f   :  { %s140_s25 = sshll.u32 %s3998_s19, 4  ;;  %p3902_p2 = scmp.ne.s32.totalorder %s4396_s12, %s3901_s28  ;;  %s141_s25 = int_to_ptr.vmem [resolvable:$true] %s140_s25 }
  0xa0   :  { %p3905_p3 = scmp.lt.u32.totalorder %s3901_s28, %s4396_s12 }
  0xa2   :  { %p3907_p4 = pnand %p3905_p3, %p3902_p2 }
  0xa4   :  { %3910 = shalt.err (!%p3907_p4)
}
  0xa5   :  { %s3911_s7 = scalar_lea.vmem %s141_s25, 14336  ;;  %p3916_p6 = scmp.lt.s32.totalorder %s141_s25, %s141_s25 }
  0xa6   :  { %p3912_p5 = scmp.ne.s32.totalorder %s141_s25, %s3911_s7  ;;  %p3917_p7 = scmp.lt.s32.totalorder %s3911_s7, %s3911_s7 }
  0xa8   :  { %p3918_p8 = por %p3917_p7, %p3916_p6 }
  0xaa   :  { %p3919_p9 = pnand %p3918_p8, %p3912_p5 }
  0xac   :  { %3922 = shalt.err (!%p3919_p9)
}
  0xad   :  { %s3999_s11 = smov 448   ;;  %s4000_s27 = smov 28  }
  0xae   :  { %146 = dma.hbm_to_vmem [thread:$0]  %s4396_s12, 14336, %s141_s25, [#allocation18], %s3999_s11, %s3999_s11, %s4000_s27  }
  0xaf   :  { %3967 = dma.done.wait [#allocation3], 2688  }
  0xb0   :  { %3968 = vsyncadd [#allocation3], 4294964608 }
  0xb1   :  { %3969 = dma.done.wait [#allocation6], 14720  }
  0xb2   :  { %3970 = vsyncadd [#allocation6], 4294952576 }
  0xb3   :  { %3971 = dma.done.wait [#allocation9], 2064  }
  0xb4   :  { %3972 = vsyncadd [#allocation9], 4294965232 }
  0xb5   :  { %3973 = dma.done.wait [#allocation12], 272  }
  0xb6   :  { %3974 = vsyncadd [#allocation12], 4294967024 }
  0xb7   :  { %3975 = dma.done.wait [#allocation15], 48  }
  0xb8   :  { %3976 = vsyncadd [#allocation15], 4294967248 }
  0xb9   :  { %3977 = dma.done.wait [#allocation18], 14336  }
  0xba   :  { %3978 = vsyncadd [#allocation18], 4294952960  ;;  %v3235_v0 = vld [vmem:[#allocation7 + $0x4] ss:$8 sps:$4 sm:$0xff]   ;;  %v3237_v1 = vld [vmem:[#allocation7] ss:$8 sps:$4 sm:$0xff]  }
  0xbb   :  { %899 = vmatprep.subr.bf16.mxu0 %v3235_v0  ;;  %v3238_v2 = vld [vmem:[#allocation7 + $0x14] ss:$8 sps:$4 sm:$0xff]   ;;  %v3240_v3 = vld [vmem:[#allocation7 + $0x10] ss:$8 sps:$4 sm:$0xff]   ;;  %v3241_v4 = vld [vmem:[#allocation7 + $0x24] ss:$8 sps:$4 sm:$0xff]  }
  0xbc   :  { %900 = vmatpush1.bf16.msra.mxu0 %v3237_v1  ;;  %v3243_v5 = vld [vmem:[#allocation7 + $0x20] ss:$8 sps:$4 sm:$0xff]   ;;  %v3244_v6 = vld [vmem:[#allocation7 + $0x34] ss:$8 sps:$4 sm:$0xff]   ;;  %v3246_v7 = vld [vmem:[#allocation7 + $0x30] ss:$8 sps:$4 sm:$0xff]  }
  0xbd   :  { %901 = vmatprep.subr.bf16.mxu0 %v3238_v2  ;;  %v3247_v8 = vld [vmem:[#allocation7 + $0x44] ss:$8 sps:$4 sm:$0xff]   ;;  %v3249_v9 = vld [vmem:[#allocation7 + $0x40] ss:$8 sps:$4 sm:$0xff]   ;;  %v3250_v10 = vld [vmem:[#allocation7 + $0x54] ss:$8 sps:$4 sm:$0xff]  }
  0xbe   :  { %v3252_v11 = vld [vmem:[#allocation7 + $0x50] ss:$8 sps:$4 sm:$0xff]   ;;  %v3253_v12 = vld [vmem:[#allocation7 + $0x64] ss:$8 sps:$4 sm:$0xff]   ;;  %v3255_v16 = vld [vmem:[#allocation7 + $0x60] ss:$8 sps:$4 sm:$0xff]  }
  0xbf   :  { %v181_v13 = vld [vmem:[#allocation2 + $0x8] sm:$0xff]  ;;  %v188_v14 = vld [vmem:[#allocation2 + $0x40] sm:$0xff]  ;;  %v3256_v17 = vld [vmem:[#allocation7 + $0x74] ss:$8 sps:$4 sm:$0xff]   ;;  %vm2772_vm0 = vcmask 523264   ;;  %s4002_s27 = smov 96  }
  0xc0   :  { %902 = vmatpush1.bf16.msra.mxu0 %v3240_v3  ;;  %v202_v15 = vpack.c.bf16 %v188_v14, %v181_v13  ;;  %v3258_v18 = vld [vmem:[#allocation7 + $0x70] ss:$8 sps:$4 sm:$0xff]   ;;  %v3259_v19 = vld [vmem:[#allocation7 + $0x84] ss:$8 sps:$4 sm:$0xff]   ;;  %v3261_v20 = vld [vmem:[#allocation7 + $0x80] ss:$8 sps:$4 sm:$0xff]  }
  0xc1   :  { %903 = vmatprep.subr.bf16.mxu0 %v3241_v4  ;;  %v3262_v21 = vld [vmem:[#allocation7 + $0x94] ss:$8 sps:$4 sm:$0xff]   ;;  %v3264_v22 = vld [vmem:[#allocation7 + $0x90] ss:$8 sps:$4 sm:$0xff]   ;;  %v3265_v23 = vld [vmem:[#allocation7 + $0xa4] ss:$8 sps:$4 sm:$0xff]  }
  0xc2   :  { %931 = vmatprep.mubr.bf16.mxu0 %v202_v15  ;;  %v3267_v24 = vld [vmem:[#allocation7 + $0xa0] ss:$8 sps:$4 sm:$0xff]   ;;  %v3268_v25 = vld [vmem:[#allocation7 + $0xb4] ss:$8 sps:$4 sm:$0xff]   ;;  %v3270_v26 = vld [vmem:[#allocation7 + $0xb0] ss:$8 sps:$4 sm:$0xff]  }
  0xc3   :  { %v3271_v27 = vld [vmem:[#allocation7 + $0xc4] ss:$8 sps:$4 sm:$0xff]   ;;  %v3273_v28 = vld [vmem:[#allocation7 + $0xc0] ss:$8 sps:$4 sm:$0xff]   ;;  %v3274_v29 = vld [vmem:[#allocation7 + $0xd4] ss:$8 sps:$4 sm:$0xff]  }
  0xc4   :  { %904 = vmatpush1.bf16.msra.mxu0 %v3243_v5  ;;  %v3276_v30 = vld [vmem:[#allocation7 + $0xd0] ss:$8 sps:$4 sm:$0xff]   ;;  %v3277_v31 = vld [vmem:[#allocation7 + $0xe4] ss:$8 sps:$4 sm:$0xff]   ;;  %v3279_v32 = vld [vmem:[#allocation7 + $0xe0] ss:$8 sps:$4 sm:$0xff]  }
  0xc5   :  { %905 = vmatprep.subr.bf16.mxu0 %v3244_v6  ;;  %v3280_v33 = vld [vmem:[#allocation7 + $0xf4] ss:$8 sps:$4 sm:$0xff]   ;;  %v3282_v34 = vld [vmem:[#allocation7 + $0xf0] ss:$8 sps:$4 sm:$0xff]   ;;  %v180_v35 = vld [vmem:[#allocation2] sm:$0xff]  ;;  %vm1475_vm1 = vcmask 261120  }
  0xc6   :  { %v187_v36 = vld [vmem:[#allocation2 + $0x38] sm:$0xff]  ;;  %v3285_v37 = vld [vmem:[#allocation7 + $0x104] ss:$8 sps:$4 sm:$0xff]   ;;  %v3283_v40 = vld [vmem:[#allocation7 + $0x100] ss:$8 sps:$4 sm:$0xff]  }
  0xc7   :  { %v195_v38 = vld [vmem:[#allocation2 + $0x78] sm:$0xff]  ;;  %v201_v39 = vpack.c.bf16 %v187_v36, %v180_v35  ;;  %v3291_v44 = vld [vmem:[#allocation7 + $0x124] ss:$8 sps:$4 sm:$0xff]   ;;  %v194_v45 = vld [vmem:[#allocation2 + $0x70] sm:$0xff] }
  0xc8   :  { %906 = vmatpush1.bf16.msra.mxu0 %v3246_v7  ;;  %v209_v41 = vpack.c.bf16 %v195_v38, %v195_v38  ;;  %v3288_v42 = vld [vmem:[#allocation7 + $0x114] ss:$8 sps:$4 sm:$0xff]   ;;  %v3286_v43 = vld [vmem:[#allocation7 + $0x110] ss:$8 sps:$4 sm:$0xff]   ;;  %v208_v48 = vpack.c.bf16 %v194_v45, %v194_v45  ;;  %v3289_v49 = vld [vmem:[#allocation7 + $0x120] ss:$8 sps:$4 sm:$0xff]  }
  0xc9   :  { %907 = vmatprep.subr.bf16.mxu0 %v3247_v8  ;;  %v183_v46 = vld [vmem:[#allocation2 + $0x18] sm:$0xff]  ;;  %v190_v47 = vld [vmem:[#allocation2 + $0x50] sm:$0xff]  ;;  %v3297_v53 = vld [vmem:[#allocation7 + $0x144] ss:$8 sps:$4 sm:$0xff]  }
  0xca   :  { %v204_v50 = vpack.c.bf16 %v190_v47, %v183_v46  ;;  %v3294_v51 = vld [vmem:[#allocation7 + $0x134] ss:$8 sps:$4 sm:$0xff]   ;;  %v3292_v52 = vld [vmem:[#allocation7 + $0x130] ss:$8 sps:$4 sm:$0xff]   ;;  %v3295_v54 = vld [vmem:[#allocation7 + $0x140] ss:$8 sps:$4 sm:$0xff]  }
  0xcb   :  { %v3300_v55 = vld [vmem:[#allocation7 + $0x154] ss:$8 sps:$4 sm:$0xff]   ;;  %v3298_v56 = vld [vmem:[#allocation7 + $0x150] ss:$8 sps:$4 sm:$0xff]   ;;  %v3303_v57 = vld [vmem:[#allocation7 + $0x164] ss:$8 sps:$4 sm:$0xff]  }
  0xcc   :  { %908 = vmatpush1.bf16.msra.mxu0 %v3249_v9  ;;  %v3301_v58 = vld [vmem:[#allocation7 + $0x160] ss:$8 sps:$4 sm:$0xff]   ;;  %v3306_v59 = vld [vmem:[#allocation7 + $0x174] ss:$8 sps:$4 sm:$0xff]   ;;  %v3304_v60 = vld [vmem:[#allocation7 + $0x170] ss:$8 sps:$4 sm:$0xff]  }
  0xcd   :  { %909 = vmatprep.subr.bf16.mxu0 %v3250_v10  ;;  %v3309_v61 = vld [vmem:[#allocation7 + $0x184] ss:$8 sps:$4 sm:$0xff]   ;;  %v3307_v62 = vld [vmem:[#allocation7 + $0x180] ss:$8 sps:$4 sm:$0xff]   ;;  %v3312_v63 = vld [vmem:[#allocation7 + $0x194] ss:$8 sps:$4 sm:$0xff]  }
  0xce   :  { %v3310_v0 = vld [vmem:[#allocation7 + $0x190] ss:$8 sps:$4 sm:$0xff]   ;;  %v3315_v1 = vld [vmem:[#allocation7 + $0x1a4] ss:$8 sps:$4 sm:$0xff]   ;;  %v3313_v2 = vld [vmem:[#allocation7 + $0x1a0] ss:$8 sps:$4 sm:$0xff]  }
  0xcf   :  { %v3318_v3 = vld [vmem:[#allocation7 + $0x1b4] ss:$8 sps:$4 sm:$0xff]   ;;  %v3403_v4 = vld [vmem:[#allocation8 + $0x40] sm:$0xff]   ;;  %v3405_v6 = vld [vmem:[#allocation8 + $0x48] sm:$0xff]  }
  0xd0   :  { %910 = vmatpush1.bf16.msra.mxu0 %v3252_v11  ;;  %v3404_v5 = vld [vmem:[#allocation8] sm:$0xff]   ;;  %v3316_v7 = vld [vmem:[#allocation7 + $0x1b0] ss:$8 sps:$4 sm:$0xff]   ;;  %3085 = vmatprep.subr.bf16.mxu1 %v3403_v4  ;;  %v3406_v10 = vld [vmem:[#allocation8 + $0x8] sm:$0xff]  }
  0xd1   :  { %911 = vmatprep.subr.bf16.mxu0 %v3253_v12  ;;  %v3321_v8 = vld [vmem:[#allocation7 + $0x1c4] ss:$8 sps:$4 sm:$0xff]   ;;  %v3319_v9 = vld [vmem:[#allocation7 + $0x1c0] ss:$8 sps:$4 sm:$0xff]   ;;  %3086 = vmatpush3.bf16.msra.mxu1 %v3404_v5  ;;  %v3407_v11 = vld [vmem:[#allocation8 + $0x50] sm:$0xff]  }
  0xd2   :  { %v3324_v12 = vld [vmem:[#allocation7 + $0x1d4] ss:$8 sps:$4 sm:$0xff]   ;;  %3087 = vmatprep.subr.bf16.mxu1 %v3405_v6  ;;  %v3322_v15 = vld [vmem:[#allocation7 + $0x1d0] ss:$8 sps:$4 sm:$0xff]   ;;  %v185_v35 = vld [vmem:[#allocation2 + $0x28] sm:$0xff] }
  0xd3   :  { %v3408_v13 = vld [vmem:[#allocation8 + $0x10] sm:$0xff]   ;;  %v3409_v14 = vld [vmem:[#allocation8 + $0x58] sm:$0xff]   ;;  %v192_v36 = vld [vmem:[#allocation2 + $0x60] sm:$0xff] }
  0xd4   :  { %912 = vmatpush1.bf16.msra.mxu0 %v3255_v16  ;;  %v3327_v16 = vld [vmem:[#allocation7 + $0x1e4] ss:$8 sps:$4 sm:$0xff]   ;;  %v3342_v38 = vld [vmem:[#allocation7 + $0x234] ss:$8 sps:$4 sm:$0xff]   ;;  %v3346_v45 = vld [vmem:[#allocation7 + $0x250] ss:$8 sps:$4 sm:$0xff]  }
  0xd5   :  { %913 = vmatprep.subr.bf16.mxu0 %v3256_v17  ;;  %3088 = vmatpush3.bf16.msra.mxu1 %v3406_v10  ;;  %v3410_v17 = vld [vmem:[#allocation8 + $0x18] sm:$0xff]   ;;  %v3351_v46 = vld [vmem:[#allocation7 + $0x264] ss:$8 sps:$4 sm:$0xff]   ;;  %v3349_v47 = vld [vmem:[#allocation7 + $0x260] ss:$8 sps:$4 sm:$0xff]  }
  0xd6   :  { %3089 = vmatprep.subr.bf16.mxu1 %v3407_v11  ;;  %v3381_v4 = vld [vmem:[#allocation7 + $0x304] ss:$8 sps:$4 sm:$0xff]   ;;  %v199_v5 = vld [vmem:[#allocation2 + $0x98] sm:$0xff]  ;;  %v198_v11 = vld [vmem:[#allocation2 + $0x90] sm:$0xff] }
  0xd7   :  { %v3382_v10 = vld [vmem:[#allocation7 + $0x310] ss:$8 sps:$4 sm:$0xff]  }
  0xd8   :  { %914 = vmatpush1.bf16.msra.mxu0 %v3258_v18  ;;  %v3411_v18 = vld [vmem:[#allocation8 + $0x60] sm:$0xff]  }
  0xd9   :  { %915 = vmatprep.subr.bf16.mxu0 %v3259_v19  ;;  %v3325_v19 = vld [vmem:[#allocation7 + $0x1e0] ss:$8 sps:$4 sm:$0xff]   ;;  %3090 = vmatpush3.bf16.msra.mxu1 %v3408_v13  ;;  %v212_v13 = vpack.c.bf16 %v198_v11, %v198_v11 }
  0xda   :  { %3091 = vmatprep.subr.bf16.mxu1 %v3409_v14  ;;  %v3385_v14 = vld [vmem:[#allocation7 + $0x320] ss:$8 sps:$4 sm:$0xff]  }
  0xdc   :  { %916 = vmatpush1.bf16.msra.mxu0 %v3261_v20  ;;  %v3330_v20 = vld [vmem:[#allocation7 + $0x1f4] ss:$8 sps:$4 sm:$0xff]  }
  0xdd   :  { %917 = vmatprep.subr.bf16.mxu0 %v3262_v21  ;;  %v3412_v21 = vld [vmem:[#allocation8 + $0x20] sm:$0xff]   ;;  %3092 = vmatpush3.bf16.msra.mxu1 %v3410_v17  ;;  %v4001_v17 = vmov 0  }
  0xde   :  { %3093 = vmatprep.subr.bf16.mxu1 %v3411_v18  ;;  %v3393_v18 = vld [vmem:[#allocation7 + $0x344] ss:$8 sps:$4 sm:$0xff]  }
  0xe0   :  { %918 = vmatpush1.bf16.msra.mxu0 %v3264_v22  ;;  %v3413_v22 = vld [vmem:[#allocation8 + $0x68] sm:$0xff]  }
  0xe1   :  { %919 = vmatprep.subr.bf16.mxu0 %v3265_v23  ;;  %v3328_v23 = vld [vmem:[#allocation7 + $0x1f0] ss:$8 sps:$4 sm:$0xff]   ;;  %3094 = vmatpush3.bf16.msra.mxu1 %v3412_v21 }
  0xe2   :  { %3095 = vmatprep.subr.bf16.mxu1 %v3413_v22  ;;  %v3394_v21 = vld [vmem:[#allocation7 + $0x350] ss:$8 sps:$4 sm:$0xff]   ;;  %v3399_v22 = vld [vmem:[#allocation7 + $0x364] ss:$8 sps:$4 sm:$0xff]  }
  0xe4   :  { %920 = vmatpush1.bf16.msra.mxu0 %v3267_v24  ;;  %v182_v24 = vld [vmem:[#allocation2 + $0x10] sm:$0xff] }
  0xe5   :  { %921 = vmatprep.subr.bf16.mxu0 %v3268_v25  ;;  %v189_v25 = vld [vmem:[#allocation2 + $0x48] sm:$0xff] }
  0xe8   :  { %922 = vmatpush1.bf16.msra.mxu0 %v3270_v26  ;;  %v3333_v26 = vld [vmem:[#allocation7 + $0x204] ss:$8 sps:$4 sm:$0xff]  }
  0xe9   :  { %923 = vmatprep.subr.bf16.mxu0 %v3271_v27  ;;  %v197_v27 = vld [vmem:[#allocation2 + $0x88] sm:$0xff] }
  0xec   :  { %924 = vmatpush1.bf16.msra.mxu0 %v3273_v28  ;;  %v3331_v28 = vld [vmem:[#allocation7 + $0x200] ss:$8 sps:$4 sm:$0xff]  }
  0xed   :  { %925 = vmatprep.subr.bf16.mxu0 %v3274_v29  ;;  %v203_v29 = vpack.c.bf16 %v189_v25, %v182_v24  ;;  %v3402_v24 = vld [vmem:[#allocation7 + $0x374] ss:$8 sps:$4 sm:$0xff]   ;;  %v3400_v25 = vld [vmem:[#allocation7 + $0x370] ss:$8 sps:$4 sm:$0xff]  }
  0xf0   :  { %926 = vmatpush1.bf16.msra.mxu0 %v3276_v30  ;;  %v3336_v30 = vld [vmem:[#allocation7 + $0x214] ss:$8 sps:$4 sm:$0xff]  }
  0xf1   :  { %927 = vmatprep.subr.bf16.mxu0 %v3277_v31  ;;  %v211_v31 = vpack.c.bf16 %v197_v27, %v197_v27  ;;  %v193_v27 = vld [vmem:[#allocation2 + $0x68] sm:$0xff] }
  0xf4   :  { %928 = vmatpush1.bf16.msra.mxu0 %v3279_v32  ;;  %v3334_v32 = vld [vmem:[#allocation7 + $0x210] ss:$8 sps:$4 sm:$0xff]  }
  0xf5   :  { %929 = vmatprep.subr.bf16.mxu0 %v3280_v33  ;;  %v196_v33 = vld [vmem:[#allocation2 + $0x80] sm:$0xff] }
  0xf8   :  { %930 = vmatpush1.bf16.msra.mxu0 %v3282_v34  ;;  %v3339_v34 = vld [vmem:[#allocation7 + $0x224] ss:$8 sps:$4 sm:$0xff]  }
  0xf9   :  { %950 = vmatprep.subr.bf16.mxu0 %v3285_v37  ;;  %v3337_v37 = vld [vmem:[#allocation7 + $0x220] ss:$8 sps:$4 sm:$0xff]  }
  0xfb   :  { %932 = vmatmul.mubr.bf16.vlgmr.msra.gmra.mrb[0].mxu0 %v201_v39  ;;  %v210_v39 = vpack.c.bf16 %v196_v33, %v196_v33  ;;  %v3416_v33 = vld [vmem:[#allocation8 + $0x30] sm:$0xff]  }
  0xfc   :  { %951 = vmatpush1.bf16.msra.mxu0 %v3283_v40  ;;  %941 = vmatprep.mubr.bf16.mxu0 %v209_v41  ;;  %v206_v40 = vpack.c.bf16 %v192_v36, %v185_v35  ;;  %v3340_v41 = vld [vmem:[#allocation7 + $0x230] ss:$8 sps:$4 sm:$0xff]   ;;  %v3419_v36 = vld [vmem:[%s4390_s6] sm:$0xff]  }
  0xfd   :  { %952 = vmatprep.subr.bf16.mxu0 %v3288_v42  ;;  %v3345_v42 = vld [vmem:[#allocation7 + $0x244] ss:$8 sps:$4 sm:$0xff]   ;;  %v3418_v35 = vld [vmem:[#allocation8 + $0x38] sm:$0xff]  }
 0x100   :  { %953 = vmatpush1.bf16.msra.mxu0 %v3286_v43  ;;  %v3343_v43 = vld [vmem:[#allocation7 + $0x240] ss:$8 sps:$4 sm:$0xff]  }
 0x101   :  { %954 = vmatprep.subr.bf16.mxu0 %v3291_v44  ;;  %v3348_v44 = vld [vmem:[#allocation7 + $0x254] ss:$8 sps:$4 sm:$0xff]  }
 0x103   :  { %942 = vmatmul.mubr.bf16.gmra.mrb[4].mxu0 %v208_v48  ;;  %v3354_v48 = vld [vmem:[#allocation7 + $0x274] ss:$8 sps:$4 sm:$0xff]  }
 0x104   :  { %955 = vmatpush1.bf16.msra.mxu0 %v3289_v49  ;;  %982 = vmatprep.mubr.bf16.mxu0 %v204_v50  ;;  %v3352_v49 = vld [vmem:[#allocation7 + $0x270] ss:$8 sps:$4 sm:$0xff]   ;;  %v3357_v50 = vld [vmem:[#allocation7 + $0x284] ss:$8 sps:$4 sm:$0xff]  }
 0x105   :  { %956 = vmatprep.subr.bf16.mxu0 %v3294_v51  ;;  %v3355_v51 = vld [vmem:[#allocation7 + $0x280] ss:$8 sps:$4 sm:$0xff]  }
 0x108   :  { %957 = vmatpush1.bf16.msra.mxu0 %v3292_v52  ;;  %v3360_v52 = vld [vmem:[#allocation7 + $0x294] ss:$8 sps:$4 sm:$0xff]  }
 0x109   :  { %958 = vmatprep.subr.bf16.mxu0 %v3297_v53  ;;  %v3358_v53 = vld [vmem:[#allocation7 + $0x290] ss:$8 sps:$4 sm:$0xff]  }
 0x10c   :  { %959 = vmatpush1.bf16.msra.mxu0 %v3295_v54  ;;  %v3363_v54 = vld [vmem:[#allocation7 + $0x2a4] ss:$8 sps:$4 sm:$0xff]  }
 0x10d   :  { %960 = vmatprep.subr.bf16.mxu0 %v3300_v55  ;;  %v3361_v55 = vld [vmem:[#allocation7 + $0x2a0] ss:$8 sps:$4 sm:$0xff]  }
 0x110   :  { %961 = vmatpush1.bf16.msra.mxu0 %v3298_v56  ;;  %v3366_v56 = vld [vmem:[#allocation7 + $0x2b4] ss:$8 sps:$4 sm:$0xff]  }
 0x111   :  { %962 = vmatprep.subr.bf16.mxu0 %v3303_v57  ;;  %v3364_v57 = vld [vmem:[#allocation7 + $0x2b0] ss:$8 sps:$4 sm:$0xff]  }
 0x114   :  { %963 = vmatpush1.bf16.msra.mxu0 %v3301_v58  ;;  %v3369_v58 = vld [vmem:[#allocation7 + $0x2c4] ss:$8 sps:$4 sm:$0xff]  }
 0x115   :  { %964 = vmatprep.subr.bf16.mxu0 %v3306_v59  ;;  %v3367_v59 = vld [vmem:[#allocation7 + $0x2c0] ss:$8 sps:$4 sm:$0xff]  }
 0x118   :  { %965 = vmatpush1.bf16.msra.mxu0 %v3304_v60  ;;  %v3372_v60 = vld [vmem:[#allocation7 + $0x2d4] ss:$8 sps:$4 sm:$0xff]  }
 0x119   :  { %966 = vmatprep.subr.bf16.mxu0 %v3309_v61  ;;  %v3370_v61 = vld [vmem:[#allocation7 + $0x2d0] ss:$8 sps:$4 sm:$0xff]  }
 0x11c   :  { %967 = vmatpush1.bf16.msra.mxu0 %v3307_v62  ;;  %v3375_v62 = vld [vmem:[#allocation7 + $0x2e4] ss:$8 sps:$4 sm:$0xff]  }
 0x11d   :  { %968 = vmatprep.subr.bf16.mxu0 %v3312_v63  ;;  %v3373_v63 = vld [vmem:[#allocation7 + $0x2e0] ss:$8 sps:$4 sm:$0xff]  }
 0x120   :  { %969 = vmatpush1.bf16.msra.mxu0 %v3310_v0  ;;  %v3378_v0 = vld [vmem:[#allocation7 + $0x2f4] ss:$8 sps:$4 sm:$0xff]  }
 0x121   :  { %970 = vmatprep.subr.bf16.mxu0 %v3315_v1  ;;  %v3376_v1 = vld [vmem:[#allocation7 + $0x2f0] ss:$8 sps:$4 sm:$0xff]  }
 0x124   :  { %971 = vmatpush1.bf16.msra.mxu0 %v3313_v2  ;;  %v184_v2 = vld [vmem:[#allocation2 + $0x20] sm:$0xff] }
 0x125   :  { %972 = vmatprep.subr.bf16.mxu0 %v3318_v3  ;;  %v191_v3 = vld [vmem:[#allocation2 + $0x58] sm:$0xff] }
 0x126   :  { %v205_v6 = vpack.c.bf16 %v191_v3, %v184_v2  ;;  %v3421_v3 = vld [vmem:[%s4390_s6 + $0x10] sm:$0xff]  }
 0x128   :  { %973 = vmatpush1.bf16.msra.mxu0 %v3316_v7  ;;  %v3379_v7 = vld [vmem:[#allocation7 + $0x300] ss:$8 sps:$4 sm:$0xff]  }
 0x129   :  { %974 = vmatprep.subr.bf16.mxu0 %v3321_v8  ;;  %v213_v8 = vpack.c.bf16 %v199_v5, %v199_v5 }
 0x12c   :  { %975 = vmatpush1.bf16.msra.mxu0 %v3319_v9  ;;  %v3384_v9 = vld [vmem:[#allocation7 + $0x314] ss:$8 sps:$4 sm:$0xff]  }
 0x12d   :  { %976 = vmatprep.subr.bf16.mxu0 %v3324_v12  ;;  %v3387_v12 = vld [vmem:[#allocation7 + $0x324] ss:$8 sps:$4 sm:$0xff]  }
 0x130   :  { %977 = vmatpush1.bf16.msra.mxu0 %v3322_v15  ;;  %v3390_v15 = vld [vmem:[#allocation7 + $0x334] ss:$8 sps:$4 sm:$0xff]  }
 0x131   :  { %978 = vmatprep.subr.bf16.mxu0 %v3327_v16  ;;  %v3388_v16 = vld [vmem:[#allocation7 + $0x330] ss:$8 sps:$4 sm:$0xff]  }
 0x134   :  { %979 = vmatpush1.bf16.msra.mxu0 %v3325_v19  ;;  %v3391_v19 = vld [vmem:[#allocation7 + $0x340] ss:$8 sps:$4 sm:$0xff]  }
 0x135   :  { %980 = vmatprep.subr.bf16.mxu0 %v3330_v20  ;;  %v3396_v20 = vld [vmem:[#allocation7 + $0x354] ss:$8 sps:$4 sm:$0xff]  }
 0x138   :  { %981 = vmatpush1.bf16.msra.mxu0 %v3328_v23  ;;  %v3397_v23 = vld [vmem:[#allocation7 + $0x360] ss:$8 sps:$4 sm:$0xff]  }
 0x139   :  { %1001 = vmatprep.subr.bf16.mxu0 %v3333_v26  ;;  %v186_v26 = vld [vmem:[#allocation2 + $0x30] sm:$0xff] }
 0x13b   :  { %983 = vmatmul.mubr.bf16.vlgmr.msra.gmra.mrb[0].mxu0 %v203_v29  ;;  %v200_v29 = vld [vmem:[#allocation2 + $0xa0] sm:$0xff] }
 0x13c   :  { %1002 = vmatpush1.bf16.msra.mxu0 %v3331_v28  ;;  %992 = vmatprep.mubr.bf16.mxu0 %v211_v31  ;;  %v207_v28 = vpack.c.bf16 %v193_v27, %v186_v26  ;;  %v3414_v31 = vld [vmem:[#allocation8 + $0x28] sm:$0xff]  }
 0x13d   :  { %1003 = vmatprep.subr.bf16.mxu0 %v3336_v30  ;;  %v214_v30 = vpack.c.bf16 %v200_v29, %v200_v29  ;;  %3096 = vmatpush3.bf16.msra.mxu1 %v3414_v31 }
 0x140   :  { %1004 = vmatpush1.bf16.msra.mxu0 %v3334_v32  ;;  %v3415_v32 = vld [vmem:[#allocation8 + $0x70] sm:$0xff]  }
 0x141   :  { %1005 = vmatprep.subr.bf16.mxu0 %v3339_v34  ;;  %3097 = vmatprep.subr.bf16.mxu1 %v3415_v32  ;;  %v3417_v34 = vld [vmem:[#allocation8 + $0x78] sm:$0xff]   ;;  %v2943_v32 = vld [vmem:[#allocation11] ss:$0 sm:$0xff] }
 0x142   :  { %3098 = vmatpush3.bf16.msra.mxu1 %v3416_v33 }
 0x143   :  { %993 = vmatmul.mubr.bf16.gmra.mrb[4].mxu0 %v210_v39  ;;  %3099 = vmatprep.subr.bf16.mxu1 %v3417_v34 }
 0x144   :  { %1006 = vmatpush1.bf16.msra.mxu0 %v3337_v37  ;;  %1033 = vmatprep.mubr.bf16.mxu0 %v206_v40  ;;  %v329_v37 = vlaneseq  ;;  %v327_v40 = vld [vmem:[%s4387_s3] sm:$0x3] }
 0x145   :  { %1007 = vmatprep.subr.bf16.mxu0 %v3342_v38 }
 0x146   :  { %3100 = vmatpush3.bf16.msra.mxu1 %v3418_v35  ;;  %v4225_v38 = vshrl.u32 %v329_v37, 7 }
 0x147   :  { %3155 = vmatprep.subr.bf16.mxu1 %v3419_v36 }
 0x148   :  { %1008 = vmatpush1.bf16.msra.mxu0 %v3340_v41  ;;  %v4228_v39 = vsub.s32 0, %v4225_v38  ;;  %v4234_v41 = vsub.s32 1, %v4225_v38 }
 0x149   :  { %1009 = vmatprep.subr.bf16.mxu0 %v3345_v42 }
 0x14a   :  { %v332_v42 = vrot.slane %v327_v40, %v4228_v39 }
 0x14c   :  { %1010 = vmatpush1.bf16.msra.mxu0 %v3343_v43  ;;  %v336_v43 = vrot.slane %v327_v40, %v4234_v41 }
 0x14d   :  { %1011 = vmatprep.subr.bf16.mxu0 %v3348_v44 }
 0x150   :  { %1012 = vmatpush1.bf16.msra.mxu0 %v3346_v45 }
 0x151   :  { %1013 = vmatprep.subr.bf16.mxu0 %v3351_v46 }
 0x154   :  { %1014 = vmatpush1.bf16.msra.mxu0 %v3349_v47 }
 0x155   :  { %1015 = vmatprep.subr.bf16.mxu0 %v3354_v48 }
 0x158   :  { %1016 = vmatpush1.bf16.msra.mxu0 %v3352_v49 }
 0x159   :  { %1017 = vmatprep.subr.bf16.mxu0 %v3357_v50 }
 0x15c   :  { %1018 = vmatpush1.bf16.msra.mxu0 %v3355_v51 }
 0x15d   :  { %1019 = vmatprep.subr.bf16.mxu0 %v3360_v52 }
 0x160   :  { %1020 = vmatpush1.bf16.msra.mxu0 %v3358_v53 }
 0x161   :  { %1021 = vmatprep.subr.bf16.mxu0 %v3363_v54 }
 0x164   :  { %1022 = vmatpush1.bf16.msra.mxu0 %v3361_v55 }
 0x165   :  { %1023 = vmatprep.subr.bf16.mxu0 %v3366_v56 }
 0x168   :  { %1024 = vmatpush1.bf16.msra.mxu0 %v3364_v57 }
 0x169   :  { %1025 = vmatprep.subr.bf16.mxu0 %v3369_v58 }
 0x16c   :  { %1026 = vmatpush1.bf16.msra.mxu0 %v3367_v59 }
 0x16d   :  { %1027 = vmatprep.subr.bf16.mxu0 %v3372_v60 }
 0x170   :  { %1028 = vmatpush1.bf16.msra.mxu0 %v3370_v61  ;;  %v3420_v61 = vld [vmem:[%s4390_s6 + $0x8] sm:$0xff]  }
 0x171   :  { %1029 = vmatprep.subr.bf16.mxu0 %v3375_v62 }
 0x174   :  { %1030 = vmatpush1.bf16.msra.mxu0 %v3373_v63 }
 0x175   :  { %1031 = vmatprep.subr.bf16.mxu0 %v3378_v0 }
 0x178   :  { %1032 = vmatpush1.bf16.msra.mxu0 %v3376_v1 }
 0x179   :  { %1052 = vmatprep.subr.bf16.mxu0 %v3381_v4 }
 0x17b   :  { %1034 = vmatmul.mubr.bf16.vlgmr.msra.gmra.mrb[0].mxu0 %v205_v6  ;;  %v3422_v6 = vld [vmem:[%s4390_s6 + $0x18] sm:$0xff]  }
 0x17c   :  { %1053 = vmatpush1.bf16.msra.mxu0 %v3379_v7  ;;  %1043 = vmatprep.mubr.bf16.mxu0 %v213_v8  ;;  %v3423_v7 = vld [vmem:[%s4390_s6 + $0x20] sm:$0xff]   ;;  %v3424_v8 = vld [vmem:[%s4390_s6 + $0x28] sm:$0xff]  }
 0x17d   :  { %1054 = vmatprep.subr.bf16.mxu0 %v3384_v9  ;;  %v3425_v9 = vld [vmem:[%s4390_s6 + $0x30] sm:$0xff]  }
 0x180   :  { %1055 = vmatpush1.bf16.msra.mxu0 %v3382_v10  ;;  %v3426_v10 = vld [vmem:[%s4390_s6 + $0x38] sm:$0xff]  }
 0x181   :  { %1056 = vmatprep.subr.bf16.mxu0 %v3387_v12  ;;  %v2926_v12 = vld [vmem:[#allocation10] ss:$0 sm:$0xff] }
 0x183   :  { %1044 = vmatmul.mubr.bf16.gmra.mrb[4].mxu0 %v212_v13 }
 0x184   :  { %1057 = vmatpush1.bf16.msra.mxu0 %v3385_v14  ;;  %1084 = vmatprep.mubr.bf16.mxu0 %v4001_v17 }
 0x185   :  { %1058 = vmatprep.subr.bf16.mxu0 %v3390_v15 }
 0x188   :  { %1059 = vmatpush1.bf16.msra.mxu0 %v3388_v16 }
 0x189   :  { %1060 = vmatprep.subr.bf16.mxu0 %v3393_v18 }
 0x18c   :  { %1061 = vmatpush1.bf16.msra.mxu0 %v3391_v19 }
 0x18d   :  { %1062 = vmatprep.subr.bf16.mxu0 %v3396_v20 }
 0x190   :  { %1063 = vmatpush1.bf16.msra.mxu0 %v3394_v21 }
 0x191   :  { %1064 = vmatprep.subr.bf16.mxu0 %v3399_v22 }
 0x194   :  { %1065 = vmatpush1.bf16.msra.mxu0 %v3397_v23 }
 0x195   :  { %1066 = vmatprep.subr.bf16.mxu0 %v3402_v24 }
 0x198   :  { %1067 = vmatpush1.bf16.msra.mxu0 %v3400_v25 }
 0x19b   :  { %1085 = vmatmul.mubr.bf16.vlgmr.msra.gmra.mrb[0].mxu0 %v207_v28 }
 0x19c   :  { %1094 = vmatprep.mubr.bf16.mxu0 %v4001_v17 }
 0x1a3   :  { %1095 = vmatmul.mubr.bf16.gmra.mrb[4].mxu0 %v214_v30 }
 0x26e   :  { %v1086_v44 = vpop.f32.mrb[0].mxu0 }
 0x26f   :  { %v3183_v45 = vadd.f32 %v1086_v44, %v332_v42  ;;  %v1088_v46 = vpop.f32.mrb[1].mxu0 }
 0x270   :  { %v3184_v47 = vadd.f32 %v1088_v46, %v336_v43  ;;  %v1090_v48 = vpop.f32.mrb[2].mxu0 }
 0x271   :  { %v3185_v49 = vadd.f32 %v1090_v48, %v332_v42  ;;  %v1092_v50 = vpop.f32.mrb[3].mxu0  ;;  %v1103_v52 = vmax.f32 %v3183_v45, 0.0  ;;  %v3427_v48 = vld [vmem:[#allocation13] sm:$0xff]  }
 0x272   :  { %v3186_v51 = vadd.f32 %v1092_v50, %v336_v43  ;;  %v1104_v54 = vmax.f32 %v3184_v47, 0.0  ;;  %v3428_v50 = vld [vmem:[#allocation13 + $0x8] sm:$0xff]  }
 0x273   :  { %v1105_v53 = vmax.f32 %v3185_v49, 0.0 }
 0x274   :  { %v1106_v55 = vmax.f32 %v3186_v51, 0.0 }
 0x275   :  { %v1109_v56 = vpack.c.bf16 %v1105_v53, %v1103_v52  ;;  %v3431_v52 = vld [vmem:[%s4394_s10 + $0x4] ss:$8 sps:$4 sm:$0xff]  }
 0x276   :  { %v1096_v57 = vpop.f32.mrb[4].mxu0  ;;  %v1110_v58 = vpack.c.bf16 %v1106_v55, %v1104_v54  ;;  %v1431_v55 = vld [vmem:[#allocation5 + $0x10] sm:$0xff] }
 0x277   :  { %v3187_v59 = vadd.f32 %v1096_v57, %v332_v42  ;;  %v1098_v60 = vpop.f32.mrb[5].mxu0  ;;  %v1429_v57 = vld [vmem:[#allocation5] sm:$0xff] }
 0x278   :  { %v3188_v62 = vadd.f32 %v1098_v60, %v336_v43  ;;  %v1100_v63 = vpop.f32.mrb[6].mxu0  ;;  %1280 = vmatprep.mubr.bf16.mxu1 %v1110_v58  ;;  %v1430_v60 = vld [vmem:[#allocation5 + $0x8] sm:$0xff] }
 0x279   :  { %v1101_v0 = vpop.f32.mrb[7].mxu0  ;;  %1281 = vmatmul.mubr.bf16.vlgmr.msra.gmra.mrb[0].mxu1 %v1109_v56  ;;  %v1107_v2 = vmax.f32 %v3187_v59, 0.0 }
 0x27a   :  { %v1108_v1 = vmax.f32 %v3188_v62, 0.0  ;;  %3156 = vmatpush3.bf16.msra.mxu1 %v3419_v36 }
 0x27b   :  { %3157 = vmatprep.subr.bf16.mxu1 %v3420_v61  ;;  %v1111_v5 = vpack.c.bf16 %v1107_v2, %v1107_v2 }
 0x27c   :  { %v1112_v4 = vpack.c.bf16 %v1108_v1, %v1108_v1 }
 0x27e   :  { %1288 = vmatprep.mubr.bf16.mxu1 %v1112_v4  ;;  %3158 = vmatpush3.bf16.msra.mxu1 %v3420_v61  ;;  %v3429_v4 = vld [vmem:[%s4394_s10] ss:$8 sps:$4 sm:$0xff]  }
 0x27f   :  { %3159 = vmatprep.subr.bf16.mxu1 %v3421_v3 }
 0x281   :  { %1289 = vmatmul.mubr.bf16.gmra.mrb[4].mxu1 %v1111_v5 }
 0x282   :  { %3160 = vmatpush3.bf16.msra.mxu1 %v3421_v3 }
 0x283   :  { %3161 = vmatprep.subr.bf16.mxu1 %v3422_v6 }
 0x286   :  { %3162 = vmatpush3.bf16.msra.mxu1 %v3422_v6  ;;  %v3434_v6 = vld [vmem:[%s4394_s10 + $0x14] ss:$8 sps:$4 sm:$0xff]  }
 0x287   :  { %3163 = vmatprep.subr.bf16.mxu1 %v3423_v7 }
 0x28a   :  { %3164 = vmatpush3.bf16.msra.mxu1 %v3423_v7  ;;  %v3432_v7 = vld [vmem:[%s4394_s10 + $0x10] ss:$8 sps:$4 sm:$0xff]  }
 0x28b   :  { %3165 = vmatprep.subr.bf16.mxu1 %v3424_v8 }
 0x28e   :  { %3166 = vmatpush3.bf16.msra.mxu1 %v3424_v8  ;;  %v3437_v8 = vld [vmem:[%s4394_s10 + $0x24] ss:$8 sps:$4 sm:$0xff]  }
 0x28f   :  { %3167 = vmatprep.subr.bf16.mxu1 %v3425_v9 }
 0x292   :  { %3168 = vmatpush3.bf16.msra.mxu1 %v3425_v9  ;;  %v3435_v9 = vld [vmem:[%s4394_s10 + $0x20] ss:$8 sps:$4 sm:$0xff]  }
 0x293   :  { %3169 = vmatprep.subr.bf16.mxu1 %v3426_v10 }
 0x296   :  { %3170 = vmatpush3.bf16.msra.mxu1 %v3426_v10  ;;  %v3440_v10 = vld [vmem:[%s4394_s10 + $0x34] ss:$8 sps:$4 sm:$0xff]  }
 0x297   :  { %3175 = vmatprep.subr.bf16.mxu1 %v3427_v48 }
 0x34c   :  { %v3101_v11 = vpop.f32.mrb[0].mxu1 }
 0x34d   :  { %v3102_v13 = vpop.f32.mrb[1].mxu1 }
 0x34e   :  { %v3103_v14 = vadd.f32 %v3102_v13, %v3101_v11  ;;  %v3104_v15 = vpop.f32.mrb[2].mxu1  ;;  %v3438_v11 = vld [vmem:[%s4394_s10 + $0x30] ss:$8 sps:$4 sm:$0xff]   ;;  %v3441_v13 = vld [vmem:[%s4394_s10 + $0x40] ss:$8 sps:$4 sm:$0xff]  }
 0x34f   :  { %v3105_v16 = vpop.f32.mrb[3].mxu1 }
 0x350   :  { %v1283_v18 = vadd.f32 %v3103_v14, %v2926_v12  ;;  %v3106_v19 = vadd.f32 %v3105_v16, %v3104_v15  ;;  %v3446_v14 = vld [vmem:[%s4394_s10 + $0x54] ss:$8 sps:$4 sm:$0xff]   ;;  %v3444_v15 = vld [vmem:[%s4394_s10 + $0x50] ss:$8 sps:$4 sm:$0xff]   ;;  %v3449_v16 = vld [vmem:[%s4394_s10 + $0x64] ss:$8 sps:$4 sm:$0xff]  }
 0x352   :  { %v1286_v20 = vadd.f32 %v3106_v19, %v2926_v12  ;;  %v1296_v21 = vmax.f32 %v1283_v18, 0.0  ;;  %v3447_v18 = vld [vmem:[%s4394_s10 + $0x60] ss:$8 sps:$4 sm:$0xff]   ;;  %v3452_v19 = vld [vmem:[%s4394_s10 + $0x74] ss:$8 sps:$4 sm:$0xff]  }
 0x354   :  { %v1297_v22 = vmax.f32 %v1286_v20, 0.0  ;;  %v3107_v23 = vpop.f32.mrb[4].mxu1  ;;  %v3450_v20 = vld [vmem:[%s4394_s10 + $0x70] ss:$8 sps:$4 sm:$0xff]  }
 0x355   :  { %v3108_v24 = vpop.f32.mrb[5].mxu1 }
 0x356   :  { %v3109_v25 = vadd.f32 %v3108_v24, %v3107_v23  ;;  %v3110_v26 = vpop.f32.mrb[6].mxu1  ;;  %v1299_v27 = vpack.c.bf16 %v1297_v22, %v1296_v21  ;;  %v3455_v21 = vld [vmem:[#allocation17 + $0x4] ss:$28 sps:$4 sm:$0xff]   ;;  %v3456_v22 = vld [vmem:[#allocation17 + $0x10] ss:$28 sps:$4 sm:$0xff]  }
 0x357   :  { %v3111_v28 = vpop.f32.mrb[7].mxu1  ;;  %v3458_v23 = vld [vmem:[#allocation17 + $0x14] ss:$28 sps:$4 sm:$0xff]   ;;  %v3464_v24 = vld [vmem:[#allocation17 + $0x4c] ss:$28 sps:$4 sm:$0xff]  }
 0x358   :  { %v1291_v29 = vadd.f32 %v3109_v25, %v2926_v12  ;;  %3171 = vmatprep.mubr.bf16.mxu1 %v1299_v27  ;;  %v3443_v12 = vld [vmem:[%s4394_s10 + $0x44] ss:$8 sps:$4 sm:$0xff]   ;;  %2547 = vmatprep.subr.bf16.mxu0 %v3458_v23  ;;  %v3462_v25 = vld [vmem:[#allocation17 + $0x48] ss:$28 sps:$4 sm:$0xff]   ;;  %v3468_v27 = vld [vmem:[#allocation17 + $0x80] ss:$28 sps:$4 sm:$0xff]  }
 0x359   :  { %2548 = vmatpush1.bf16.msra.mxu0 %v3456_v22  ;;  %v3470_v26 = vld [vmem:[#allocation17 + $0x84] ss:$28 sps:$4 sm:$0xff]   ;;  %v3476_v28 = vld [vmem:[#allocation17 + $0xbc] ss:$28 sps:$4 sm:$0xff]   ;;  %v3513_v22 = vld [vmem:[#allocation17 + $0x230] ss:$28 sps:$4 sm:$0xff]  }
 0x35a   :  { %v1298_v30 = vmax.f32 %v1291_v29, 0.0  ;;  %2549 = vmatprep.subr.bf16.mxu0 %v3464_v24  ;;  %v3474_v29 = vld [vmem:[#allocation17 + $0xb8] ss:$28 sps:$4 sm:$0xff]   ;;  %v3521_v23 = vld [vmem:[#allocation17 + $0x26c] ss:$28 sps:$4 sm:$0xff]  }
 0x35b   :  { %v3519_v24 = vld [vmem:[#allocation17 + $0x268] ss:$28 sps:$4 sm:$0xff]  }
 0x35c   :  { %v1300_v31 = vpack.c.bf16 %v1298_v30, %v1298_v30  ;;  %v3482_v30 = vld [vmem:[#allocation17 + $0xf4] ss:$28 sps:$4 sm:$0xff]  }
 0x35d   :  { %2550 = vmatpush1.bf16.msra.mxu0 %v3462_v25  ;;  %v3527_v25 = vld [vmem:[#allocation17 + $0x2a4] ss:$28 sps:$4 sm:$0xff]  }
 0x35e   :  { %3172 = vmatmul.mubr.bf16.vlgmr.msra.gmra.mrb[8].mxu1 %v1300_v31  ;;  %2551 = vmatprep.subr.bf16.mxu0 %v3470_v26  ;;  %v3480_v31 = vld [vmem:[#allocation17 + $0xf0] ss:$28 sps:$4 sm:$0xff]   ;;  %v3525_v26 = vld [vmem:[#allocation17 + $0x2a0] ss:$28 sps:$4 sm:$0xff]  }
 0x35f   :  { %3176 = vmatpush3.bf16.msra.mxu1 %v3427_v48  ;;  %v3522_v48 = vld [vmem:[#allocation17 + $0x278] ss:$28 sps:$4 sm:$0xff]  }
 0x360   :  { %3177 = vmatprep.subr.bf16.mxu1 %v3428_v50 }
 0x361   :  { %2552 = vmatpush1.bf16.msra.mxu0 %v3468_v27  ;;  %v3533_v27 = vld [vmem:[#allocation17 + $0x2dc] ss:$28 sps:$4 sm:$0xff]  }
 0x362   :  { %2553 = vmatprep.subr.bf16.mxu0 %v3476_v28  ;;  %v3531_v28 = vld [vmem:[#allocation17 + $0x2d8] ss:$28 sps:$4 sm:$0xff]  }
 0x363   :  { %3178 = vmatpush3.bf16.msra.mxu1 %v3428_v50  ;;  %v3528_v50 = vld [vmem:[#allocation17 + $0x2b0] ss:$28 sps:$4 sm:$0xff]  }
 0x364   :  { %1643 = vmatprep.subr.bf16.mxu1 %v3431_v52  ;;  %v3534_v52 = vld [vmem:[#allocation17 + $0x2e8] ss:$28 sps:$4 sm:$0xff]  }
 0x365   :  { %2554 = vmatpush1.bf16.msra.mxu0 %v3474_v29  ;;  %v3539_v29 = vld [vmem:[#allocation17 + $0x314] ss:$28 sps:$4 sm:$0xff]  }
 0x366   :  { %2555 = vmatprep.subr.bf16.mxu0 %v3482_v30  ;;  %v3537_v30 = vld [vmem:[#allocation17 + $0x310] ss:$28 sps:$4 sm:$0xff]  }
 0x369   :  { %2556 = vmatpush1.bf16.msra.mxu0 %v3480_v31  ;;  %v3542_v31 = vld [vmem:[#allocation17 + $0x324] ss:$28 sps:$4 sm:$0xff]  }
 0x431   :  { %v3173_v33 = vpop.f32.mrb[8].mxu1 }
 0x432   :  { %v1415_v34 = vadd.f32 %v3173_v33, %v2943_v32  ;;  %v1406_v35 = vpop.f32.mrb[9].mxu1  ;;  %v3486_v33 = vld [vmem:[#allocation17 + $0x128] ss:$28 sps:$4 sm:$0xff]  }
 0x433   :  { %v1407_v36 = vadd.f32 %v2943_v32, %v1406_v35  ;;  %v3174_v37 = vpop.f32.mrb[10].mxu1  ;;  %v3492_v35 = vld [vmem:[#allocation17 + $0x160] ss:$28 sps:$4 sm:$0xff]  }
 0x434   :  { %v1422_v40 = vmul.f32 0.5, %v1415_v34  ;;  %2775 = vst.msk [vmem:[#allocation20 + $0x10] sm:$0xff] %vm2772_vm0, %v1415_v34  ;;  %v1409_v42 = vpop.f32.mrb[11].mxu1  ;;  %v3498_v37 = vld [vmem:[#allocation17 + $0x198] ss:$28 sps:$4 sm:$0xff]  }
 0x435   :  { %v1420_v43 = vmul.f32 0.5, %v1407_v36  ;;  %2773 = vst.msk [vmem:[#allocation20] sm:$0xff] %vm2772_vm0, %v1407_v36  ;;  %v1410_v44 = vadd.f32 %v2943_v32, %v1409_v42  ;;  %v3488_v32 = vld [vmem:[#allocation17 + $0x12c] ss:$28 sps:$4 sm:$0xff]  }
 0x436   :  { %v1427_v45 = vmul.f32 1.442695, %v1422_v40  ;;  %2557 = vmatprep.subr.bf16.mxu0 %v3488_v32  ;;  %v3506_v40 = vld [vmem:[#allocation17 + $0x1d4] ss:$28 sps:$4 sm:$0xff]   ;;  %v3540_v32 = vld [vmem:[#allocation17 + $0x320] ss:$28 sps:$4 sm:$0xff]  }
 0x437   :  { %v1423_v46 = vmul.f32 1.442695, %v1420_v43  ;;  %v1421_v47 = vmul.f32 0.5, %v1410_v44  ;;  %2774 = vst.msk [vmem:[#allocation20 + $0x8] sm:$0xff] %vm2772_vm0, %v1410_v44  ;;  %2558 = vmatpush1.bf16.msra.mxu0 %v3486_v33  ;;  %v3504_v42 = vld [vmem:[#allocation17 + $0x1d0] ss:$28 sps:$4 sm:$0xff]  }
 0x438   :  { %3613 = vpow2.f32 %v1427_v45  ;;  %v3512_v43 = vld [vmem:[#allocation17 + $0x20c] ss:$28 sps:$4 sm:$0xff]   ;;  %v3518_v45 = vld [vmem:[#allocation17 + $0x244] ss:$28 sps:$4 sm:$0xff]  }
 0x439   :  { %3615 = vpow2.f32 %v1423_v46  ;;  %v1425_v49 = vmul.f32 1.442695, %v1421_v47  ;;  %v3516_v46 = vld [vmem:[#allocation17 + $0x240] ss:$28 sps:$4 sm:$0xff]   ;;  %v3545_v33 = vld [vmem:[#allocation17 + $0x34c] ss:$28 sps:$4 sm:$0xff]  }
 0x43a   :  { %v3524_v47 = vld [vmem:[#allocation17 + $0x27c] ss:$28 sps:$4 sm:$0xff]  }
 0x43b   :  { %3617 = vpow2.f32 %v1425_v49  ;;  %v3530_v49 = vld [vmem:[#allocation17 + $0x2b4] ss:$28 sps:$4 sm:$0xff]  }
 0x442   :  { %v3614_v51 = vpop.eup %3613 }
 0x443   :  { %v3616_v53 = vpop.eup %3615  ;;  %1439 = vrot.lane.b32.xlu1 %v3614_v51, %s4002_s27  ;;  %v3536_v51 = vld [vmem:[#allocation17 + $0x2ec] ss:$28 sps:$4 sm:$0xff]  }
 0x444   :  { %1435 = vrot.lane.b32.xlu0 %v3616_v53, %s4002_s27  ;;  %v2952_v53 = vld [vmem:[#allocation14] ss:$0 sm:$0xff] }
 0x445   :  { %v3618_v54 = vpop.eup %3617 }
 0x448   :  { %1437 = vrot.lane.b32.xlu0 %v3618_v54, %s4002_s27 }
 0x4b5   :  { %v1440_v56 = vpop.permute.xlu1 %1439 }
 0x4b6   :  { %v1436_v58 = vpop.permute.xlu0 %1435  ;;  %v1446_v59 = vmul.f32 %v1440_v56, %v1431_v55 }
 0x4b7   :  { %v1444_v61 = vmul.f32 %v1436_v58, %v1429_v57 }
 0x4b8   :  { %v1449_v0 = vadd.f32 %v1446_v59, %v1415_v34  ;;  %v3494_v34 = vld [vmem:[#allocation17 + $0x164] ss:$28 sps:$4 sm:$0xff]  }
 0x4b9   :  { %v1447_v1 = vadd.f32 %v1444_v61, %v1407_v36  ;;  %2559 = vmatprep.subr.bf16.mxu0 %v3494_v34  ;;  %v3500_v36 = vld [vmem:[#allocation17 + $0x19c] ss:$28 sps:$4 sm:$0xff]   ;;  %v3543_v34 = vld [vmem:[#allocation17 + $0x348] ss:$28 sps:$4 sm:$0xff]  }
 0x4ba   :  { %v1438_v62 = vpop.permute.xlu0 %1437  ;;  %v1451_v5 = vpack.c.bf16 %v1449_v0, %v1449_v0  ;;  %2560 = vmatpush1.bf16.msra.mxu0 %v3492_v35  ;;  %v3548_v35 = vld [vmem:[#allocation17 + $0x35c] ss:$28 sps:$4 sm:$0xff]  }
 0x4bb   :  { %v1445_v63 = vmul.f32 %v1438_v62, %v1430_v60  ;;  %2561 = vmatprep.subr.bf16.mxu0 %v3500_v36  ;;  %v3453_v62 = vld [vmem:[#allocation17] ss:$28 sps:$4 sm:$0xff]   ;;  %v3546_v36 = vld [vmem:[#allocation17 + $0x358] ss:$28 sps:$4 sm:$0xff]  }
 0x4bd   :  { %v1448_v2 = vadd.f32 %v1445_v63, %v1410_v44  ;;  %v3510_v44 = vld [vmem:[#allocation17 + $0x208] ss:$28 sps:$4 sm:$0xff]  }
 0x4be   :  { %2562 = vmatpush1.bf16.msra.mxu0 %v3498_v37  ;;  %v3551_v37 = vld [vmem:[#allocation17 + $0xc] ss:$28 sps:$4 sm:$0xff]  }
 0x4bf   :  { %v1450_v3 = vpack.c.bf16 %v1448_v2, %v1447_v1  ;;  %2563 = vmatprep.subr.bf16.mxu0 %v3506_v40  ;;  %v3461_v1 = vld [vmem:[#allocation17 + $0x3c] ss:$28 sps:$4 sm:$0xff]  }
 0x4c0   :  { %v3459_v2 = vld [vmem:[#allocation17 + $0x38] ss:$28 sps:$4 sm:$0xff]   ;;  %v1551_v40 = vld [vmem:[#allocation16] sm:$0x3] }
 0x4c1   :  { %3179 = vmatprep.mubr.msk.bf16.mxu1 %vm1475_vm1, %v1450_v3 }
 0x4c2   :  { %3180 = vmatmul.mubr.msk.bf16.vlgmr.msra.gmra.mrb[12].mxu1 %vm1475_vm1, %v1451_v5  ;;  %2564 = vmatpush1.bf16.msra.mxu0 %v3504_v42  ;;  %v3465_v5 = vld [vmem:[#allocation17 + $0x70] ss:$28 sps:$4 sm:$0xff]   ;;  %v1556_v42 = vrot.slane %v1551_v40, %v4228_v39 }
 0x4c3   :  { %1644 = vmatpush1.bf16.msra.mxu1 %v3429_v4  ;;  %1675 = vmatprep.mubr.bf16.mxu1 %v4001_v17  ;;  %v3467_v4 = vld [vmem:[#allocation17 + $0x74] ss:$28 sps:$4 sm:$0xff]  }
 0x4c4   :  { %1645 = vmatprep.subr.bf16.mxu1 %v3434_v6  ;;  %2565 = vmatprep.subr.bf16.mxu0 %v3512_v43  ;;  %v1560_v43 = vrot.slane %v1551_v40, %v4234_v41  ;;  %v3600_v40 = vld [vmem:[#allocation17 + $0x50] ss:$28 sps:$4 sm:$0xff]  }
 0x4c6   :  { %2566 = vmatpush1.bf16.msra.mxu0 %v3510_v44 }
 0x4c7   :  { %1646 = vmatpush1.bf16.msra.mxu1 %v3432_v7  ;;  %2567 = vmatprep.subr.bf16.mxu0 %v3518_v45  ;;  %v3473_v7 = vld [vmem:[#allocation17 + $0xac] ss:$28 sps:$4 sm:$0xff]  }
 0x4c8   :  { %1647 = vmatprep.subr.bf16.mxu1 %v3437_v8  ;;  %v3471_v8 = vld [vmem:[#allocation17 + $0xa8] ss:$28 sps:$4 sm:$0xff]  }
 0x4ca   :  { %2568 = vmatpush1.bf16.msra.mxu0 %v3516_v46 }
 0x4cb   :  { %1648 = vmatpush1.bf16.msra.mxu1 %v3435_v9  ;;  %2569 = vmatprep.subr.bf16.mxu0 %v3524_v47  ;;  %v3479_v9 = vld [vmem:[#allocation17 + $0xe4] ss:$28 sps:$4 sm:$0xff]  }
 0x4cc   :  { %1649 = vmatprep.subr.bf16.mxu1 %v3440_v10  ;;  %v3477_v10 = vld [vmem:[#allocation17 + $0xe0] ss:$28 sps:$4 sm:$0xff]  }
 0x4ce   :  { %2570 = vmatpush1.bf16.msra.mxu0 %v3522_v48 }
 0x4cf   :  { %1650 = vmatpush1.bf16.msra.mxu1 %v3438_v11  ;;  %2571 = vmatprep.subr.bf16.mxu0 %v3530_v49  ;;  %v3485_v11 = vld [vmem:[#allocation17 + $0x11c] ss:$28 sps:$4 sm:$0xff]  }
 0x4d0   :  { %1651 = vmatprep.subr.bf16.mxu1 %v3443_v12  ;;  %v3491_v12 = vld [vmem:[#allocation17 + $0x154] ss:$28 sps:$4 sm:$0xff]  }
 0x4d2   :  { %2572 = vmatpush1.bf16.msra.mxu0 %v3528_v50 }
 0x4d3   :  { %1652 = vmatpush1.bf16.msra.mxu1 %v3441_v13  ;;  %2573 = vmatprep.subr.bf16.mxu0 %v3536_v51  ;;  %v3489_v13 = vld [vmem:[#allocation17 + $0x150] ss:$28 sps:$4 sm:$0xff]  }
 0x4d4   :  { %1653 = vmatprep.subr.bf16.mxu1 %v3446_v14  ;;  %v3497_v14 = vld [vmem:[#allocation17 + $0x18c] ss:$28 sps:$4 sm:$0xff]  }
 0x4d6   :  { %2574 = vmatpush1.bf16.msra.mxu0 %v3534_v52 }
 0x4d7   :  { %1654 = vmatpush1.bf16.msra.mxu1 %v3444_v15  ;;  %v3495_v15 = vld [vmem:[#allocation17 + $0x188] ss:$28 sps:$4 sm:$0xff]   ;;  %2575 = vmatprep.subr.bf16.mxu0 %v3542_v31  ;;  %v3593_v31 = vld [vmem:[#allocation17 + $0x31c] ss:$28 sps:$4 sm:$0xff]  }
 0x4d8   :  { %1655 = vmatprep.subr.bf16.mxu1 %v3449_v16  ;;  %v3503_v16 = vld [vmem:[#allocation17 + $0x1c4] ss:$28 sps:$4 sm:$0xff]  }
 0x4da   :  { %2576 = vmatpush1.bf16.msra.mxu0 %v3540_v32  ;;  %v3591_v32 = vld [vmem:[#allocation17 + $0x318] ss:$28 sps:$4 sm:$0xff]  }
 0x4db   :  { %1656 = vmatpush1.bf16.msra.mxu1 %v3447_v18  ;;  %v3501_v18 = vld [vmem:[#allocation17 + $0x1c0] ss:$28 sps:$4 sm:$0xff]   ;;  %2577 = vmatprep.subr.bf16.mxu0 %v3548_v35  ;;  %v3597_v35 = vld [vmem:[#allocation17 + $0x1d8] ss:$28 sps:$4 sm:$0xff]  }
 0x4dc   :  { %1657 = vmatprep.subr.bf16.mxu1 %v3452_v19  ;;  %v3509_v19 = vld [vmem:[#allocation17 + $0x1fc] ss:$28 sps:$4 sm:$0xff]  }
 0x4de   :  { %2578 = vmatpush1.bf16.msra.mxu0 %v3546_v36  ;;  %v3598_v36 = vld [vmem:[#allocation17 + $0x18] ss:$28 sps:$4 sm:$0xff]  }
 0x4df   :  { %1658 = vmatpush1.bf16.msra.mxu1 %v3450_v20  ;;  %v3507_v20 = vld [vmem:[#allocation17 + $0x1f8] ss:$28 sps:$4 sm:$0xff]  }
 0x4e0   :  { %2445 = vmatprep.subr.bf16.mxu1 %v3455_v21  ;;  %v3515_v21 = vld [vmem:[#allocation17 + $0x234] ss:$28 sps:$4 sm:$0xff]  }
 0x595   :  { %v3181_v54 = vpop.f32.mrb[12].mxu1 }
 0x596   :  { %v1516_v55 = vpop.f32.mrb[13].mxu1  ;;  %v1525_v63 = vadd.f32 %v3181_v54, %v2952_v53 }
 0x597   :  { %v1517_v56 = vadd.f32 %v2952_v53, %v1516_v55  ;;  %v3182_v57 = vpop.f32.mrb[14].mxu1 }
 0x598   :  { %v1519_v58 = vpop.f32.mrb[15].mxu1  ;;  %v1532_v3 = vmax.f32 %v1525_v63, 0.0 }
 0x599   :  { %v1520_v59 = vadd.f32 %v2952_v53, %v1519_v58  ;;  %v1530_v60 = vmax.f32 %v1517_v56, 0.0 }
 0x59a   :  { %v1534_v6 = vpack.c.bf16 %v1532_v3, %v1532_v3  ;;  %v3552_v3 = vld [vmem:[#allocation17 + $0x40] ss:$28 sps:$4 sm:$0xff]  }
 0x59b   :  { %v1531_v61 = vmax.f32 %v1520_v59, 0.0  ;;  %v3549_v59 = vld [vmem:[#allocation17 + $0x8] ss:$28 sps:$4 sm:$0xff]  }
 0x59d   :  { %v1533_v0 = vpack.c.bf16 %v1531_v61, %v1530_v60 }
 0x59f   :  { %1676 = vmatmul.mubr.bf16.vlgmr.msra.gmra.mrb[16].mxu1 %v1533_v0 }
 0x5a0   :  { %1685 = vmatprep.mubr.bf16.mxu1 %v4001_v17  ;;  %2446 = vmatpush1.bf16.msra.mxu1 %v3453_v62  ;;  %v3483_v17 = vld [vmem:[#allocation17 + $0x118] ss:$28 sps:$4 sm:$0xff]   ;;  %v3554_v62 = vld [vmem:[#allocation17 + $0x44] ss:$28 sps:$4 sm:$0xff]  }
 0x5a1   :  { %2447 = vmatprep.subr.bf16.mxu1 %v3461_v1 }
 0x5a4   :  { %2448 = vmatpush1.bf16.msra.mxu1 %v3459_v2 }
 0x5a5   :  { %2449 = vmatprep.subr.bf16.mxu1 %v3467_v4 }
 0x5a7   :  { %1686 = vmatmul.mubr.bf16.gmra.mrb[20].mxu1 %v1534_v6 }
 0x5a8   :  { %2450 = vmatpush1.bf16.msra.mxu1 %v3465_v5  ;;  %v3557_v5 = vld [vmem:[#allocation17 + $0x7c] ss:$28 sps:$4 sm:$0xff]  }
 0x5a9   :  { %2451 = vmatprep.subr.bf16.mxu1 %v3473_v7  ;;  %v3555_v7 = vld [vmem:[#allocation17 + $0x78] ss:$28 sps:$4 sm:$0xff]  }
 0x5ac   :  { %2452 = vmatpush1.bf16.msra.mxu1 %v3471_v8 }
 0x5ad   :  { %2453 = vmatprep.subr.bf16.mxu1 %v3479_v9  ;;  %v3560_v9 = vld [vmem:[#allocation17 + $0xb4] ss:$28 sps:$4 sm:$0xff]  }
 0x5b0   :  { %2454 = vmatpush1.bf16.msra.mxu1 %v3477_v10  ;;  %v3558_v10 = vld [vmem:[#allocation17 + $0xb0] ss:$28 sps:$4 sm:$0xff]  }
 0x5b1   :  { %2455 = vmatprep.subr.bf16.mxu1 %v3485_v11  ;;  %v3563_v11 = vld [vmem:[#allocation17 + $0xec] ss:$28 sps:$4 sm:$0xff]  }
 0x5b4   :  { %2456 = vmatpush1.bf16.msra.mxu1 %v3483_v17  ;;  %v3561_v17 = vld [vmem:[#allocation17 + $0xe8] ss:$28 sps:$4 sm:$0xff]  }
 0x5b5   :  { %2457 = vmatprep.subr.bf16.mxu1 %v3491_v12  ;;  %v3566_v12 = vld [vmem:[#allocation17 + $0x124] ss:$28 sps:$4 sm:$0xff]  }
 0x5b8   :  { %2458 = vmatpush1.bf16.msra.mxu1 %v3489_v13  ;;  %v3564_v13 = vld [vmem:[#allocation17 + $0x120] ss:$28 sps:$4 sm:$0xff]  }
 0x5b9   :  { %2459 = vmatprep.subr.bf16.mxu1 %v3497_v14  ;;  %v3569_v14 = vld [vmem:[#allocation17 + $0x15c] ss:$28 sps:$4 sm:$0xff]  }
 0x5bc   :  { %2460 = vmatpush1.bf16.msra.mxu1 %v3495_v15  ;;  %v3567_v15 = vld [vmem:[#allocation17 + $0x158] ss:$28 sps:$4 sm:$0xff]  }
 0x5bd   :  { %2461 = vmatprep.subr.bf16.mxu1 %v3503_v16  ;;  %v3572_v16 = vld [vmem:[#allocation17 + $0x194] ss:$28 sps:$4 sm:$0xff]  }
 0x5c0   :  { %2462 = vmatpush1.bf16.msra.mxu1 %v3501_v18  ;;  %v3570_v18 = vld [vmem:[#allocation17 + $0x190] ss:$28 sps:$4 sm:$0xff]  }
 0x5c1   :  { %2463 = vmatprep.subr.bf16.mxu1 %v3509_v19  ;;  %v3575_v19 = vld [vmem:[#allocation17 + $0x1cc] ss:$28 sps:$4 sm:$0xff]  }
 0x5c4   :  { %2464 = vmatpush1.bf16.msra.mxu1 %v3507_v20  ;;  %v3573_v20 = vld [vmem:[#allocation17 + $0x1c8] ss:$28 sps:$4 sm:$0xff]  }
 0x5c5   :  { %2465 = vmatprep.subr.bf16.mxu1 %v3515_v21  ;;  %v3578_v21 = vld [vmem:[#allocation17 + $0x204] ss:$28 sps:$4 sm:$0xff]  }
 0x5c8   :  { %2466 = vmatpush1.bf16.msra.mxu1 %v3513_v22  ;;  %v3576_v22 = vld [vmem:[#allocation17 + $0x200] ss:$28 sps:$4 sm:$0xff]  }
 0x5c9   :  { %2467 = vmatprep.subr.bf16.mxu1 %v3521_v23  ;;  %v3581_v23 = vld [vmem:[#allocation17 + $0x23c] ss:$28 sps:$4 sm:$0xff]  }
 0x5cc   :  { %2468 = vmatpush1.bf16.msra.mxu1 %v3519_v24  ;;  %v3579_v24 = vld [vmem:[#allocation17 + $0x238] ss:$28 sps:$4 sm:$0xff]  }
 0x5cd   :  { %2469 = vmatprep.subr.bf16.mxu1 %v3527_v25  ;;  %v3584_v25 = vld [vmem:[#allocation17 + $0x274] ss:$28 sps:$4 sm:$0xff]  }
 0x5d0   :  { %2470 = vmatpush1.bf16.msra.mxu1 %v3525_v26  ;;  %v3582_v26 = vld [vmem:[#allocation17 + $0x270] ss:$28 sps:$4 sm:$0xff]  }
 0x5d1   :  { %2471 = vmatprep.subr.bf16.mxu1 %v3533_v27  ;;  %v3587_v27 = vld [vmem:[#allocation17 + $0x2ac] ss:$28 sps:$4 sm:$0xff]  }
 0x5d4   :  { %2472 = vmatpush1.bf16.msra.mxu1 %v3531_v28  ;;  %v3585_v28 = vld [vmem:[#allocation17 + $0x2a8] ss:$28 sps:$4 sm:$0xff]  }
 0x5d5   :  { %2473 = vmatprep.subr.bf16.mxu1 %v3539_v29  ;;  %v3590_v29 = vld [vmem:[#allocation17 + $0x2e4] ss:$28 sps:$4 sm:$0xff]  }
 0x5d8   :  { %2474 = vmatpush1.bf16.msra.mxu1 %v3537_v30  ;;  %v3588_v30 = vld [vmem:[#allocation17 + $0x2e0] ss:$28 sps:$4 sm:$0xff]  }
 0x5d9   :  { %2475 = vmatprep.subr.bf16.mxu1 %v3545_v33  ;;  %v3596_v33 = vld [vmem:[#allocation17 + $0x354] ss:$28 sps:$4 sm:$0xff]  }
 0x5dc   :  { %2476 = vmatpush1.bf16.msra.mxu1 %v3543_v34  ;;  %v3594_v34 = vld [vmem:[#allocation17 + $0x350] ss:$28 sps:$4 sm:$0xff]  }
 0x5dd   :  { %2496 = vmatprep.subr.bf16.mxu1 %v3551_v37  ;;  %v3599_v37 = vld [vmem:[#allocation17 + $0x210] ss:$28 sps:$4 sm:$0xff]  }
 0x672   :  { %v1677_v44 = vpop.f32.mrb[16].mxu1 }
 0x673   :  { %v1678_v45 = vadd.f32 %v1677_v44, %v1556_v42  ;;  %v1679_v46 = vpop.f32.mrb[17].mxu1  ;;  %v3603_v44 = vld [vmem:[#allocation17 + $0x280] ss:$28 sps:$4 sm:$0xff]  }
 0x674   :  { %v1680_v47 = vadd.f32 %v1679_v46, %v1560_v43  ;;  %v1681_v48 = vpop.f32.mrb[18].mxu1  ;;  %v3605_v46 = vld [vmem:[#allocation17 + $0x2b8] ss:$28 sps:$4 sm:$0xff]  }
 0x675   :  { %v1682_v49 = vadd.f32 %v1681_v48, %v1556_v42  ;;  %v1683_v50 = vpop.f32.mrb[19].mxu1  ;;  %v1694_v52 = vmax.f32 %v1678_v45, 0.0  ;;  %v3604_v45 = vld [vmem:[#allocation17 + $0xc0] ss:$28 sps:$4 sm:$0xff]   ;;  %v3607_v48 = vld [vmem:[#allocation17 + $0x2f0] ss:$28 sps:$4 sm:$0xff]  }
 0x676   :  { %v1684_v51 = vadd.f32 %v1683_v50, %v1560_v43  ;;  %v1695_v54 = vmax.f32 %v1680_v47, 0.0  ;;  %v3606_v47 = vld [vmem:[#allocation17 + $0xf8] ss:$28 sps:$4 sm:$0xff]   ;;  %v3609_v50 = vld [vmem:[#allocation17 + $0x328] ss:$28 sps:$4 sm:$0xff]  }
 0x677   :  { %v1696_v53 = vmax.f32 %v1682_v49, 0.0  ;;  %v3608_v49 = vld [vmem:[#allocation17 + $0x130] ss:$28 sps:$4 sm:$0xff]  }
 0x678   :  { %v1697_v55 = vmax.f32 %v1684_v51, 0.0  ;;  %v3610_v51 = vld [vmem:[#allocation17 + $0x168] ss:$28 sps:$4 sm:$0xff]  }
 0x679   :  { %v4311_v56 = vpack.c.bf16 %v1696_v53, %v1694_v52  ;;  %v3611_v52 = vld [vmem:[#allocation17 + $0x360] ss:$28 sps:$4 sm:$0xff]  }
 0x67a   :  { %v4313_v57 = vpack.c.bf16 %v1697_v55, %v1695_v54  ;;  %v1687_v58 = vpop.f32.mrb[20].mxu1  ;;  %v3612_v53 = vld [vmem:[#allocation17 + $0x1a0] ss:$28 sps:$4 sm:$0xff]   ;;  %v1852_v54 = vsub.s32 4, %v4225_v38  ;;  %v4339_v55 = vld [vmem:[%s4397_s13] sm:$0xff]  ;;  %s4003_s13 = smov [#allocation20]  }
 0x67b   :  { %v1688_v60 = vadd.f32 %v1687_v58, %v1556_v42  ;;  %v1689_v61 = vpop.f32.mrb[21].mxu1  ;;  %v3601_v42 = vld [vmem:[#allocation17 + $0x248] ss:$28 sps:$4 sm:$0xff]   ;;  %v1837_v58 = vrot.slane %v4339_v55, %v4228_v39  ;;  %s2793_s8 = sshll.u32 %s4003_s13, 4  ;;  %s2794_s8 = int_to_ptr.vmem [resolvable:$true] %s2793_s8 }
 0x67c   :  { %v1690_v63 = vadd.f32 %v1689_v61, %v1560_v43  ;;  %v1691_v0 = vpop.f32.mrb[22].mxu1  ;;  %2477 = vmatprep.mubr.bf16.mxu1 %v4313_v57  ;;  %2579 = vmatprep.mubr.bf16.mxu0 %v4313_v57  ;;  %v3602_v43 = vld [vmem:[#allocation17 + $0x88] ss:$28 sps:$4 sm:$0xff]   ;;  %s3923_s1 = scalar_lea.vmem %s2794_s8, 384  ;;  %p3928_p11 = scmp.lt.s32.totalorder %s2794_s8, %s2794_s8 }
 0x67d   :  { %v1692_v1 = vpop.f32.mrb[23].mxu1  ;;  %2478 = vmatmul.mubr.bf16.vlgmr.msra.gmra.mrb[24].mxu1 %v4311_v56  ;;  %2580 = vmatmul.mubr.bf16.vlgmr.msra.gmra.mrb[8].mxu0 %v4311_v56  ;;  %v1698_v4 = vmax.f32 %v1688_v60, 0.0  ;;  %p3924_p10 = scmp.ne.s32.totalorder %s2794_s8, %s3923_s1  ;;  %p3929_p12 = scmp.lt.s32.totalorder %s3923_s1, %s3923_s1 }
 0x67e   :  { %v1699_v2 = vmax.f32 %v1690_v63, 0.0  ;;  %2497 = vmatpush1.bf16.msra.mxu1 %v3549_v59  ;;  %v1853_v59 = vrot.slane %v4339_v55, %v1852_v54 }
 0x67f   :  { %2498 = vmatprep.subr.bf16.mxu1 %v3554_v62  ;;  %v4322_v8 = vpack.c.bf16 %v1698_v4, %v1698_v4  ;;  %p3930_p13 = por %p3929_p12, %p3928_p11 }
 0x680   :  { %v4319_v6 = vpack.c.bf16 %v1699_v2, %v1699_v2 }
 0x681   :  { %p3931_p0 = pnand %p3930_p13, %p3924_p10 }
 0x682   :  { %2499 = vmatpush1.bf16.msra.mxu1 %v3552_v3  ;;  %2487 = vmatprep.mubr.bf16.mxu1 %v4319_v6 }
 0x683   :  { %2589 = vmatprep.mubr.bf16.mxu0 %v4319_v6  ;;  %2500 = vmatprep.subr.bf16.mxu1 %v3557_v5 }
 0x685   :  { %2488 = vmatmul.mubr.bf16.gmra.mrb[28].mxu1 %v4322_v8  ;;  %2590 = vmatmul.mubr.bf16.gmra.mrb[12].mxu0 %v4322_v8 }
 0x686   :  { %2501 = vmatpush1.bf16.msra.mxu1 %v3555_v7  ;;  %2528 = vmatprep.mubr.bf16.mxu1 %v4313_v57 }
 0x687   :  { %2502 = vmatprep.subr.bf16.mxu1 %v3560_v9 }
 0x68a   :  { %2503 = vmatpush1.bf16.msra.mxu1 %v3558_v10 }
 0x68b   :  { %2504 = vmatprep.subr.bf16.mxu1 %v3563_v11 }
 0x68e   :  { %2505 = vmatpush1.bf16.msra.mxu1 %v3561_v17 }
 0x68f   :  { %2506 = vmatprep.subr.bf16.mxu1 %v3566_v12 }
 0x692   :  { %2507 = vmatpush1.bf16.msra.mxu1 %v3564_v13 }
 0x693   :  { %2508 = vmatprep.subr.bf16.mxu1 %v3569_v14 }
 0x696   :  { %2509 = vmatpush1.bf16.msra.mxu1 %v3567_v15 }
 0x697   :  { %2510 = vmatprep.subr.bf16.mxu1 %v3572_v16 }
 0x69a   :  { %2511 = vmatpush1.bf16.msra.mxu1 %v3570_v18 }
 0x69b   :  { %2512 = vmatprep.subr.bf16.mxu1 %v3575_v19 }
 0x69e   :  { %2513 = vmatpush1.bf16.msra.mxu1 %v3573_v20 }
 0x69f   :  { %2514 = vmatprep.subr.bf16.mxu1 %v3578_v21 }
 0x6a2   :  { %2515 = vmatpush1.bf16.msra.mxu1 %v3576_v22 }
 0x6a3   :  { %2516 = vmatprep.subr.bf16.mxu1 %v3581_v23 }
 0x6a6   :  { %2517 = vmatpush1.bf16.msra.mxu1 %v3579_v24 }
 0x6a7   :  { %2518 = vmatprep.subr.bf16.mxu1 %v3584_v25 }
 0x6aa   :  { %2519 = vmatpush1.bf16.msra.mxu1 %v3582_v26 }
 0x6ab   :  { %2520 = vmatprep.subr.bf16.mxu1 %v3587_v27 }
 0x6ae   :  { %2521 = vmatpush1.bf16.msra.mxu1 %v3585_v28 }
 0x6af   :  { %2522 = vmatprep.subr.bf16.mxu1 %v3590_v29 }
 0x6b2   :  { %2523 = vmatpush1.bf16.msra.mxu1 %v3588_v30 }
 0x6b3   :  { %2524 = vmatprep.subr.bf16.mxu1 %v3593_v31 }
 0x6b6   :  { %2525 = vmatpush1.bf16.msra.mxu1 %v3591_v32 }
 0x6b7   :  { %2526 = vmatprep.subr.bf16.mxu1 %v3596_v33 }
 0x6ba   :  { %2527 = vmatpush1.bf16.msra.mxu1 %v3594_v34 }
 0x6bb   :  { %3127 = vmatprep.subr.bf16.mxu1 %v3597_v35 }
 0x6bd   :  { %2529 = vmatmul.mubr.bf16.vlgmr.msra.gmra.mrb[32].mxu1 %v4311_v56 }
 0x6be   :  { %2538 = vmatprep.mubr.bf16.mxu1 %v4319_v6  ;;  %3128 = vmatpush3.bf16.msra.mxu1 %v3598_v36 }
 0x6bf   :  { %3129 = vmatprep.subr.bf16.mxu1 %v3599_v37 }
 0x6c2   :  { %3130 = vmatpush3.bf16.msra.mxu1 %v3600_v40 }
 0x6c3   :  { %3131 = vmatprep.subr.bf16.mxu1 %v3601_v42 }
 0x6c5   :  { %2539 = vmatmul.mubr.bf16.gmra.mrb[36].mxu1 %v4322_v8 }
 0x6c6   :  { %3132 = vmatpush3.bf16.msra.mxu1 %v3602_v43  ;;  %2630 = vmatprep.mubr.bf16.mxu1 %v4313_v57  ;;  %v1856_v57 = vsub.s32 5, %v4225_v38 }
 0x6c7   :  { %3133 = vmatprep.subr.bf16.mxu1 %v3603_v44 }
 0x6c8   :  { %v1857_v60 = vrot.slane %v4339_v55, %v1856_v57 }
 0x6ca   :  { %3134 = vmatpush3.bf16.msra.mxu1 %v3604_v45 }
 0x6cb   :  { %3135 = vmatprep.subr.bf16.mxu1 %v3605_v46 }
 0x6ce   :  { %3136 = vmatpush3.bf16.msra.mxu1 %v3606_v47 }
 0x6cf   :  { %3137 = vmatprep.subr.bf16.mxu1 %v3607_v48 }
 0x6d2   :  { %3138 = vmatpush3.bf16.msra.mxu1 %v3608_v49 }
 0x6d3   :  { %3139 = vmatprep.subr.bf16.mxu1 %v3609_v50 }
 0x6d6   :  { %3140 = vmatpush3.bf16.msra.mxu1 %v3610_v51 }
 0x6d7   :  { %3141 = vmatprep.subr.bf16.mxu1 %v3611_v52 }
 0x6da   :  { %3142 = vmatpush3.bf16.msra.mxu1 %v3612_v53 }
 0x6dd   :  { %2631 = vmatmul.mubr.bf16.vlgmr.msra.gmra.mrb[40].mxu1 %v4311_v56  ;;  %v1841_v56 = vrot.slane %v4339_v55, %v4234_v41 }
 0x6de   :  { %2638 = vmatprep.mubr.bf16.mxu1 %v4319_v6 }
 0x6e5   :  { %2639 = vmatmul.mubr.bf16.gmra.mrb[44].mxu1 %v4322_v8 }
 0x750   :  { %v2479_v61 = vpop.f32.mrb[24].mxu1  ;;  %v2581_v62 = vpop.f32.mrb[8].mxu0 }
 0x751   :  { %v2480_v63 = vadd.f32 %v2479_v61, %v1837_v58  ;;  %v2582_v0 = vadd.f32 %v2581_v62, %v1853_v59  ;;  %v2481_v1 = vpop.f32.mrb[25].mxu1  ;;  %v2583_v2 = vpop.f32.mrb[9].mxu0 }
 0x752   :  { %v2482_v3 = vadd.f32 %v2481_v1, %v1841_v56  ;;  %v2584_v4 = vadd.f32 %v2583_v2, %v1857_v60  ;;  %v2483_v5 = vpop.f32.mrb[26].mxu1  ;;  %v2585_v6 = vpop.f32.mrb[10].mxu0 }
 0x753   :  { %v2646_v7 = vsub.f32 0.0, %v2480_v63  ;;  %v2650_v8 = vsub.f32 0.0, %v2582_v0  ;;  %v2484_v39 = vadd.f32 %v2483_v5, %v1837_v58  ;;  %v2586_v9 = vadd.f32 %v2585_v6, %v1853_v59  ;;  %v2485_v10 = vpop.f32.mrb[27].mxu1  ;;  %v2587_v11 = vpop.f32.mrb[11].mxu0 }
 0x754   :  { %v2647_v17 = vsub.f32 0.0, %v2482_v3  ;;  %v2651_v41 = vsub.f32 0.0, %v2584_v4  ;;  %v2486_v12 = vadd.f32 %v2485_v10, %v1841_v56  ;;  %v2588_v13 = vadd.f32 %v2587_v11, %v1857_v60 }
 0x755   :  { %v2667_v14 = vmul.f32 1.442695, %v2646_v7  ;;  %v2675_v15 = vmul.f32 1.442695, %v2650_v8  ;;  %v2653_v16 = vsub.f32 0.0, %v2484_v39  ;;  %v2657_v18 = vsub.f32 0.0, %v2586_v9 }
 0x756   :  { %v2669_v19 = vmul.f32 1.442695, %v2647_v17  ;;  %v2677_v20 = vmul.f32 1.442695, %v2651_v41  ;;  %v2654_v21 = vsub.f32 0.0, %v2486_v12  ;;  %v2658_v22 = vsub.f32 0.0, %v2588_v13 }
 0x757   :  { %3619 = vpow2.f32 %v2667_v14  ;;  %v2681_v23 = vmul.f32 1.442695, %v2653_v16  ;;  %v2689_v24 = vmul.f32 1.442695, %v2657_v18 }
 0x758   :  { %3621 = vpow2.f32 %v2675_v15  ;;  %v2489_v25 = vpop.f32.mrb[28].mxu1  ;;  %v2591_v26 = vpop.f32.mrb[12].mxu0  ;;  %v2683_v27 = vmul.f32 1.442695, %v2654_v21  ;;  %v2691_v32 = vmul.f32 1.442695, %v2658_v22 }
 0x759   :  { %3623 = vpow2.f32 %v2669_v19  ;;  %v2490_v28 = vadd.f32 %v2489_v25, %v1837_v58  ;;  %v2592_v29 = vadd.f32 %v2591_v26, %v1853_v59  ;;  %v2491_v30 = vpop.f32.mrb[29].mxu1  ;;  %v2593_v31 = vpop.f32.mrb[13].mxu0 }
 0x75a   :  { %3625 = vpow2.f32 %v2677_v20  ;;  %v2492_v33 = vadd.f32 %v2491_v30, %v1841_v56  ;;  %v2594_v34 = vadd.f32 %v2593_v31, %v1857_v60  ;;  %v2493_v35 = vpop.f32.mrb[30].mxu1  ;;  %v2595_v36 = vpop.f32.mrb[14].mxu0 }
 0x75b   :  { %3627 = vpow2.f32 %v2681_v23  ;;  %v2660_v37 = vsub.f32 0.0, %v2490_v28  ;;  %v2664_v40 = vsub.f32 0.0, %v2592_v29  ;;  %v2494_v42 = vpop.f32.mrb[31].mxu1  ;;  %v2596_v43 = vpop.f32.mrb[15].mxu0 }
 0x75c   :  { %3629 = vpow2.f32 %v2689_v24  ;;  %v2661_v44 = vsub.f32 0.0, %v2492_v33  ;;  %v2665_v45 = vsub.f32 0.0, %v2594_v34 }
 0x75d   :  { %3631 = vpow2.f32 %v2683_v27  ;;  %v2695_v46 = vmul.f32 1.442695, %v2660_v37  ;;  %v2703_v47 = vmul.f32 1.442695, %v2664_v40 }
 0x75e   :  { %3633 = vpow2.f32 %v2691_v32  ;;  %v2697_v48 = vmul.f32 1.442695, %v2661_v44  ;;  %v2705_v49 = vmul.f32 1.442695, %v2665_v45 }
 0x75f   :  { %3934 = shalt.err (!%p3931_p0)
}
 0x760   :  { %s3935_s21 = scalar_lea.hbm %s4399_s15, 384 }
 0x761   :  { %p3936_p1 = scmp.ne.s32.totalorder %s4399_s15, %s3935_s21  ;;  %p3939_p2 = scmp.lt.u32.totalorder %s3935_s21, %s4399_s15 }
 0x763   :  { %p3941_p3 = pnand %p3939_p2, %p3936_p1 }
 0x765   :  { %3944 = shalt.err (!%p3941_p3)
}
 0x766   :  { %2799 = dma.vmem_to_hbm [thread:$0]  %s2794_s8, 384, %s4399_s15, [#allocation21], %s4405_s24, %s4405_s24, %s4404_s18   ;;  %3635 = vpow2.f32 %v2695_v46  ;;  %v3620_v50 = vpop.eup %3619  ;;  %v1844_v21 = vsub.s32 2, %v4225_v38  ;;  %v1848_v22 = vsub.s32 3, %v4225_v38 }
 0x767   :  { %3637 = vpow2.f32 %v2703_v47  ;;  %v3622_v51 = vpop.eup %3621  ;;  %v2709_v52 = vadd.f32 1.0, %v3620_v50  ;;  %s4004_s15 = smov [#allocation19]  }
 0x768   :  { %3639 = vpow2.f32 %v2697_v48  ;;  %v3624_v53 = vpop.eup %3623  ;;  %v2713_v54 = vadd.f32 1.0, %v3622_v51  ;;  %v1845_v23 = vrot.slane %v4339_v55, %v1844_v21  ;;  %v1849_v24 = vrot.slane %v4339_v55, %v1848_v22  ;;  %s2781_s18 = sshll.u32 %s4004_s15, 4  ;;  %s2782_s18 = int_to_ptr.vmem [resolvable:$true] %s2781_s18 }
 0x769   :  { %3641 = vpow2.f32 %v2705_v49  ;;  %v3626_v57 = vpop.eup %3625  ;;  %v2710_v58 = vadd.f32 1.0, %v3624_v53  ;;  %s3945_s24 = scalar_lea.vmem %s2782_s18, 2688  ;;  %p3950_p5 = scmp.lt.s32.totalorder %s2782_s18, %s2782_s18 }
 0x76a   :  { %3643 = vrcp.f32 %v2709_v52  ;;  %v3628_v59 = vpop.eup %3627  ;;  %v2714_v56 = vadd.f32 1.0, %v3626_v57  ;;  %p3946_p4 = scmp.ne.s32.totalorder %s2782_s18, %s3945_s24  ;;  %p3951_p6 = scmp.lt.s32.totalorder %s3945_s24, %s3945_s24 }
 0x76b   :  { %3645 = vrcp.f32 %v2713_v54  ;;  %v3630_v60 = vpop.eup %3629  ;;  %v2716_v61 = vadd.f32 1.0, %v3628_v59 }
 0x76c   :  { %3647 = vrcp.f32 %v2710_v58  ;;  %v3632_v62 = vpop.eup %3631  ;;  %v2720_v63 = vadd.f32 1.0, %v3630_v60  ;;  %p3952_p7 = por %p3951_p6, %p3950_p5 }
 0x76d   :  { %3649 = vrcp.f32 %v2714_v56  ;;  %v3634_v0 = vpop.eup %3633  ;;  %v2717_v1 = vadd.f32 1.0, %v3632_v62 }
 0x76e   :  { %3651 = vrcp.f32 %v2716_v61  ;;  %v2721_v3 = vadd.f32 1.0, %v3634_v0  ;;  %p3953_p8 = pnand %p3952_p7, %p3946_p4 }
 0x76f   :  { %3653 = vrcp.f32 %v2720_v63 }
 0x770   :  { %v3636_v2 = vpop.eup %3635  ;;  %3655 = vrcp.f32 %v2717_v1 }
 0x771   :  { %v3638_v4 = vpop.eup %3637  ;;  %v2723_v5 = vadd.f32 1.0, %v3636_v2  ;;  %3657 = vrcp.f32 %v2721_v3  ;;  %v1860_v3 = vsub.s32 6, %v4225_v38 }
 0x772   :  { %v3640_v6 = vpop.eup %3639  ;;  %v2727_v7 = vadd.f32 1.0, %v3638_v4 }
 0x773   :  { %v3642_v8 = vpop.eup %3641  ;;  %3659 = vrcp.f32 %v2723_v5  ;;  %v2724_v39 = vadd.f32 1.0, %v3640_v6 }
 0x774   :  { %3661 = vrcp.f32 %v2727_v7  ;;  %v2728_v9 = vadd.f32 1.0, %v3642_v8  ;;  %v3644_v10 = vpop.eup %3643  ;;  %v1861_v8 = vrot.slane %v4339_v55, %v1860_v3 }
 0x775   :  { %3663 = vrcp.f32 %v2724_v39  ;;  %v3646_v11 = vpop.eup %3645  ;;  %2751 = vst [vmem:[#allocation19] sm:$0xff] %v3644_v10 }
 0x776   :  { %3665 = vrcp.f32 %v2728_v9  ;;  %v3648_v17 = vpop.eup %3647  ;;  %2755 = vst [vmem:[#allocation19 + $0x20] sm:$0xff] %v3646_v11 }
 0x777   :  { %v3650_v41 = vpop.eup %3649  ;;  %2752 = vst [vmem:[#allocation19 + $0x8] sm:$0xff] %v3648_v17 }
 0x778   :  { %v3652_v12 = vpop.eup %3651  ;;  %2756 = vst [vmem:[#allocation19 + $0x28] sm:$0xff] %v3650_v41 }
 0x779   :  { %v3654_v13 = vpop.eup %3653  ;;  %2758 = vst [vmem:[#allocation19 + $0x38] sm:$0xff] %v3652_v12 }
 0x77a   :  { %v3656_v14 = vpop.eup %3655  ;;  %2762 = vst [vmem:[#allocation19 + $0x58] sm:$0xff] %v3654_v13 }
 0x77b   :  { %v3658_v15 = vpop.eup %3657  ;;  %2759 = vst [vmem:[#allocation19 + $0x40] sm:$0xff] %v3656_v14 }
 0x77c   :  { %2763 = vst [vmem:[#allocation19 + $0x60] sm:$0xff] %v3658_v15 }
 0x77d   :  { %v3660_v16 = vpop.eup %3659 }
 0x77e   :  { %v3662_v18 = vpop.eup %3661  ;;  %2765 = vst [vmem:[#allocation19 + $0x70] sm:$0xff] %v3660_v16 }
 0x77f   :  { %v3664_v19 = vpop.eup %3663  ;;  %2769 = vst [vmem:[#allocation19 + $0x90] sm:$0xff] %v3662_v18 }
 0x780   :  { %v3666_v20 = vpop.eup %3665  ;;  %2766 = vst [vmem:[#allocation19 + $0x78] sm:$0xff] %v3664_v19 }
 0x781   :  { %2770 = vst [vmem:[#allocation19 + $0x98] sm:$0xff] %v3666_v20 }
 0x790   :  { %v2530_v25 = vpop.f32.mrb[32].mxu1 }
 0x791   :  { %v2531_v26 = vadd.f32 %v2530_v25, %v1845_v23  ;;  %v2532_v27 = vpop.f32.mrb[33].mxu1 }
 0x792   :  { %v2533_v28 = vadd.f32 %v2532_v27, %v1849_v24  ;;  %v2534_v29 = vpop.f32.mrb[34].mxu1 }
 0x793   :  { %v2648_v30 = vsub.f32 0.0, %v2531_v26  ;;  %v2535_v31 = vadd.f32 %v2534_v29, %v1845_v23  ;;  %v2536_v32 = vpop.f32.mrb[35].mxu1 }
 0x794   :  { %v2649_v33 = vsub.f32 0.0, %v2533_v28  ;;  %v2537_v34 = vadd.f32 %v2536_v32, %v1849_v24 }
 0x795   :  { %v2671_v35 = vmul.f32 1.442695, %v2648_v30  ;;  %v2655_v36 = vsub.f32 0.0, %v2535_v31 }
 0x796   :  { %v2673_v37 = vmul.f32 1.442695, %v2649_v33  ;;  %v2656_v40 = vsub.f32 0.0, %v2537_v34 }
 0x797   :  { %3667 = vpow2.f32 %v2671_v35  ;;  %v2685_v42 = vmul.f32 1.442695, %v2655_v36 }
 0x798   :  { %3669 = vpow2.f32 %v2673_v37  ;;  %v2687_v43 = vmul.f32 1.442695, %v2656_v40  ;;  %v2540_v44 = vpop.f32.mrb[36].mxu1 }
 0x799   :  { %3671 = vpow2.f32 %v2685_v42  ;;  %v2541_v45 = vadd.f32 %v2540_v44, %v1845_v23  ;;  %v2542_v46 = vpop.f32.mrb[37].mxu1 }
 0x79a   :  { %3673 = vpow2.f32 %v2687_v43  ;;  %v2543_v47 = vadd.f32 %v2542_v46, %v1849_v24  ;;  %v2544_v48 = vpop.f32.mrb[38].mxu1 }
 0x79b   :  { %v2662_v49 = vsub.f32 0.0, %v2541_v45  ;;  %v2545_v50 = vpop.f32.mrb[39].mxu1 }
 0x79c   :  { %v2663_v51 = vsub.f32 0.0, %v2543_v47 }
 0x79d   :  { %v2699_v52 = vmul.f32 1.442695, %v2662_v49 }
 0x79e   :  { %v2701_v53 = vmul.f32 1.442695, %v2663_v51 }
 0x79f   :  { %3675 = vpow2.f32 %v2699_v52 }
 0x7a0   :  { %3677 = vpow2.f32 %v2701_v53 }
 0x7a1   :  { %v3668_v54 = vpop.eup %3667 }
 0x7a2   :  { %v3670_v57 = vpop.eup %3669  ;;  %v2711_v58 = vadd.f32 1.0, %v3668_v54 }
 0x7a3   :  { %v3672_v59 = vpop.eup %3671  ;;  %v2712_v56 = vadd.f32 1.0, %v3670_v57 }
 0x7a4   :  { %v3674_v60 = vpop.eup %3673  ;;  %3679 = vrcp.f32 %v2711_v58  ;;  %v2718_v61 = vadd.f32 1.0, %v3672_v59 }
 0x7a5   :  { %3681 = vrcp.f32 %v2712_v56  ;;  %v2719_v62 = vadd.f32 1.0, %v3674_v60 }
 0x7a6   :  { %3683 = vrcp.f32 %v2718_v61 }
 0x7a7   :  { %3685 = vrcp.f32 %v2719_v62 }
 0x7a9   :  { %v3676_v63 = vpop.eup %3675 }
 0x7aa   :  { %v3678_v0 = vpop.eup %3677  ;;  %v2725_v1 = vadd.f32 1.0, %v3676_v63 }
 0x7ab   :  { %v2726_v2 = vadd.f32 1.0, %v3678_v0 }
 0x7ac   :  { %3687 = vrcp.f32 %v2725_v1 }
 0x7ad   :  { %3689 = vrcp.f32 %v2726_v2 }
 0x7ae   :  { %v3680_v4 = vpop.eup %3679 }
 0x7af   :  { %v3682_v5 = vpop.eup %3681  ;;  %2753 = vst [vmem:[#allocation19 + $0x10] sm:$0xff] %v3680_v4 }
 0x7b0   :  { %v3684_v6 = vpop.eup %3683  ;;  %2754 = vst [vmem:[#allocation19 + $0x18] sm:$0xff] %v3682_v5  ;;  %v3143_v7 = vpop.f32.mrb[40].mxu1 }
 0x7b1   :  { %v3686_v39 = vpop.eup %3685  ;;  %2760 = vst [vmem:[#allocation19 + $0x48] sm:$0xff] %v3684_v6  ;;  %v3144_v9 = vpop.f32.mrb[41].mxu1 }
 0x7b2   :  { %2761 = vst [vmem:[#allocation19 + $0x50] sm:$0xff] %v3686_v39  ;;  %v3145_v10 = vadd.f32 %v3144_v9, %v3143_v7  ;;  %v3146_v11 = vpop.f32.mrb[42].mxu1 }
 0x7b3   :  { %v3147_v17 = vpop.f32.mrb[43].mxu1 }
 0x7b4   :  { %v2633_v41 = vadd.f32 %v3145_v10, %v1861_v8  ;;  %v3148_v12 = vadd.f32 %v3147_v17, %v3146_v11 }
 0x7b6   :  { %v3688_v13 = vpop.eup %3687  ;;  %v2652_v38 = vsub.f32 0.0, %v2633_v41  ;;  %v2636_v14 = vadd.f32 %v3148_v12, %v1861_v8 }
 0x7b7   :  { %v3690_v15 = vpop.eup %3689  ;;  %2767 = vst [vmem:[#allocation19 + $0x80] sm:$0xff] %v3688_v13 }
 0x7b8   :  { %2768 = vst [vmem:[#allocation19 + $0x88] sm:$0xff] %v3690_v15  ;;  %v2679_v16 = vmul.f32 1.442695, %v2652_v38  ;;  %v2659_v18 = vsub.f32 0.0, %v2636_v14  ;;  %v3149_v19 = vpop.f32.mrb[44].mxu1 }
 0x7b9   :  { %v3150_v20 = vpop.f32.mrb[45].mxu1 }
 0x7ba   :  { %3691 = vpow2.f32 %v2679_v16  ;;  %v2693_v55 = vmul.f32 1.442695, %v2659_v18  ;;  %v3151_v21 = vadd.f32 %v3150_v20, %v3149_v19  ;;  %v3152_v22 = vpop.f32.mrb[46].mxu1 }
 0x7bb   :  { %v3153_v23 = vpop.f32.mrb[47].mxu1 }
 0x7bc   :  { %3693 = vpow2.f32 %v2693_v55  ;;  %v2641_v24 = vadd.f32 %v3151_v21, %v1861_v8 }
 0x7be   :  { %v2666_v25 = vsub.f32 0.0, %v2641_v24 }
 0x7c0   :  { %v2707_v26 = vmul.f32 1.442695, %v2666_v25 }
 0x7c2   :  { %3695 = vpow2.f32 %v2707_v26 }
 0x7c4   :  { %v3692_v27 = vpop.eup %3691 }
 0x7c5   :  { %v2715_v28 = vadd.f32 1.0, %v3692_v27 }
 0x7c6   :  { %v3694_v29 = vpop.eup %3693 }
 0x7c7   :  { %3697 = vrcp.f32 %v2715_v28  ;;  %v2722_v30 = vadd.f32 1.0, %v3694_v29 }
 0x7c9   :  { %3699 = vrcp.f32 %v2722_v30 }
 0x7cc   :  { %v3696_v31 = vpop.eup %3695 }
 0x7cd   :  { %v2729_v32 = vadd.f32 1.0, %v3696_v31 }
 0x7cf   :  { %3701 = vrcp.f32 %v2729_v32 }
 0x7d1   :  { %v3698_v33 = vpop.eup %3697 }
 0x7d2   :  { %2757 = vst [vmem:[#allocation19 + $0x30] sm:$0xff] %v3698_v33 }
 0x7d3   :  { %v3700_v34 = vpop.eup %3699 }
 0x7d4   :  { %2764 = vst [vmem:[#allocation19 + $0x68] sm:$0xff] %v3700_v34 }
 0x7d9   :  { %v3702_v35 = vpop.eup %3701 }
 0x7da   :  { %2771 = vst [vmem:[#allocation19 + $0xa0] sm:$0xff] %v3702_v35 }
 0x7db   :  { %3956 = shalt.err (!%p3953_p8)
}
 0x7dc   :  { %s3957_s11 = scalar_lea.hbm %s4398_s14, 2688 }
 0x7dd   :  { %p3958_p9 = scmp.ne.s32.totalorder %s4398_s14, %s3957_s11  ;;  %p3961_p10 = scmp.lt.u32.totalorder %s3957_s11, %s4398_s14 }
 0x7df   :  { %p3963_p11 = pnand %p3961_p10, %p3958_p9 }
 0x7e1   :  { %3966 = shalt.err (!%p3963_p11)
}
 0x7e2   :  { %2787 = dma.vmem_to_hbm [thread:$0]  %s2782_s18, 2688, %s4398_s14, [#allocation4], %s3992_s9, %s3992_s9, %s3993_s22  }
 0x7e3   :  { %3979 = dma.done.wait [#allocation4], 2688  }
 0x7e4   :  { %3980 = vsyncadd [#allocation4], 4294964608 }
 0x7e5   :  { %3981 = dma.done.wait [#allocation21], 384  }
 0x7e6   :  { %3982 = vsyncadd [#allocation21], 4294966912 }
 0x7e7   :  { %2806 = vsyncpa [#allocation3], 1 }
 0x7e8   :  { %2807 = vsyncpa [#allocation6], 1 }
 0x7e9   :  { %2808 = vsyncpa [#allocation9], 1 }
 0x7ea   :  { %2809 = vsyncpa [#allocation12], 1 }
 0x7eb   :  { %2810 = vsyncpa [#allocation15], 1 }
 0x7ec   :  { %2811 = vsyncpa [#allocation18], 1 }
 0x7ed   :  { %2812 = vsyncpa [#allocation4], 1 }
 0x7ee   :  { %2813 = vsyncpa [#allocation21], 1 }

</bundles_post_ra>
